<compile_context>
chip_gen: v5e
topology: v5e:2x2
jax: 0.10.0
libtpu: 0.0.40
codegen_flags: <defaults>
</compile_context>

<pallas_src>
import jax
import jax.numpy as jnp
from jax.experimental import pallas as pl
from jax.experimental.pallas import tpu as pltpu

LANE = 128
SUBLANE = 8  # x is kept f32 in HBM -> 8-row sublane granularity


def _round_up(n, m):
    return ((n + m - 1) // m) * m


def chunk_classifier_kernel(x_ref, w1_ref, b1_ref, w2_ref, b2_ref, o_ref):
    # hidden = relu(x @ W1 + b1): cast the x tile to bf16 in-kernel (hidden
    # under the MXU), bf16 x bf16 matmul with f32 accumulation.
    x_bf = x_ref[...].astype(jnp.bfloat16)
    h = jnp.dot(x_bf, w1_ref[...], preferred_element_type=jnp.float32)
    h = jnp.maximum(h + b1_ref[...], 0.0)          # f32 VPU epilogue (v5e-friendly)
    # Dropout(0.3): identity at inference time.
    # TODO(synk): training-mode dropout would use pltpu.prng_seed / prng_random_bits.
    # logits (lane-dense 128-wide padded head): bf16 x bf16, f32 accumulation.
    out = jnp.dot(h.astype(jnp.bfloat16), w2_ref[...],
                  preferred_element_type=jnp.float32)
    o_ref[...] = (out + b2_ref[...]).astype(o_ref.dtype)


def prepare_params(w1, b1, w2, b2):
    """One-time parameter prep (hoisted out of the forward path).

    w1: [in, hidden], w2: [hidden, out] (x @ W layout).
    Returns (w1_bf16, b1_f32[1,H], w2_bf16 padded to 128 lanes, b2_f32 padded,
    output_dim)."""
    input_dim, hidden_dim = w1.shape
    hidden_dim2, output_dim = w2.shape
    assert hidden_dim == hidden_dim2
    n_pad = _round_up(output_dim, LANE)

    w1_bf = w1.astype(jnp.bfloat16)
    b1_f = b1.reshape(1, hidden_dim).astype(jnp.float32)
    w2_bf = jnp.zeros((hidden_dim, n_pad), jnp.bfloat16)
    w2_bf = w2_bf.at[:, :output_dim].set(w2.astype(jnp.bfloat16))
    b2_f = jnp.zeros((1, n_pad), jnp.float32)
    b2_f = b2_f.at[:, :output_dim].set(b2.reshape(1, output_dim).astype(jnp.float32))
    return w1_bf, b1_f, w2_bf, b2_f, output_dim


def chunk_classifier_forward(x, params, *, tm=512):
    """x: [B, input_dim] f32.  params: output of prepare_params().
    Returns logits [B, output_dim] f32."""
    w1_bf, b1_f, w2_bf, b2_f, output_dim = params
    B, input_dim = x.shape
    assert w1_bf.shape[0] == input_dim
    hidden_dim = w1_bf.shape[1]
    n_pad = w2_bf.shape[1]

    # ---- batch tiling: pad only to the sublane multiple; partial last block
    # ---- is masked by the Pallas pipeline (grid = cdiv). ----
    b_pad = _round_up(B, SUBLANE)
    if b_pad != B:
        x = jnp.pad(x, ((0, b_pad - B), (0, 0)))
    tm_eff = min(tm, b_pad)                       # multiple of 8 by construction
    grid = (pl.cdiv(b_pad, tm_eff),)

    # ---- megacore gating (v7x): batch-sharding replicates the resident
    # ---- weight DMAs per TensorCore, so only shard when x/out dominates. ----
    xo_bytes = b_pad * input_dim * 4 + b_pad * n_pad * 4
    w_bytes = (input_dim * hidden_dim + hidden_dim * n_pad) * 2 \
        + (hidden_dim + n_pad) * 4
    dim_sem = ("parallel",) if (grid[0] > 1 and xo_bytes > 2 * w_bytes) \
        else ("arbitrary",)

    flops = 2 * b_pad * input_dim * hidden_dim + 2 * b_pad * hidden_dim * n_pad
    bytes_accessed = (b_pad * input_dim * 4           # x (f32)
                      + input_dim * hidden_dim * 2    # W1 (bf16)
                      + hidden_dim * 4                # b1 (f32)
                      + hidden_dim * n_pad * 2        # W2 (bf16, padded)
                      + n_pad * 4                     # b2 (f32, padded)
                      + b_pad * n_pad * 4)            # out (f32)

    resident = dict(pipeline_mode=pl.Buffered(1))     # weights: single-buffered

    out_padded = pl.pallas_call(
        chunk_classifier_kernel,
        out_shape=jax.ShapeDtypeStruct((b_pad, n_pad), jnp.float32),
        grid_spec=pltpu.PrefetchScalarGridSpec(
            num_scalar_prefetch=0,
            grid=grid,
            in_specs=[
                pl.BlockSpec((tm_eff, input_dim), lambda i: (i, 0)),  # x tile
                pl.BlockSpec((input_dim, hidden_dim), lambda i: (0, 0),
                             **resident),                             # W1 resident
                pl.BlockSpec((1, hidden_dim), lambda i: (0, 0),
                             **resident),                             # b1 resident
                pl.BlockSpec((hidden_dim, n_pad), lambda i: (0, 0),
                             **resident),                             # W2 resident
                pl.BlockSpec((1, n_pad), lambda i: (0, 0),
                             **resident),                             # b2 resident
            ],
            out_specs=pl.BlockSpec((tm_eff, n_pad), lambda i: (i, 0)),
        ),
        compiler_params=pltpu.CompilerParams(dimension_semantics=dim_sem),
        cost_estimate=pl.CostEstimate(
            flops=flops, transcendentals=0, bytes_accessed=bytes_accessed),
    )(x, w1_bf, b1_f, w2_bf, b2_f)

    return out_padded[:B, :output_dim]


def init_params(key, input_dim=1536, hidden_dim=512, output_dim=7):
    """Deterministic synthetic parameters (same shapes as the nn.Module),
    stored as [in, out] for x @ W layout (transpose of nn.Linear's [out, in])."""
    k1, k2, k3, k4 = jax.random.split(key, 4)
    w1 = jax.random.uniform(
        k1, (input_dim, hidden_dim), jnp.float32,
        minval=-1.0, maxval=1.0) * (1.0 / jnp.sqrt(input_dim))
    b1 = jax.random.uniform(
        k2, (1, hidden_dim), jnp.float32,
        minval=-1.0, maxval=1.0) * (1.0 / jnp.sqrt(input_dim))
    w2 = jax.random.uniform(
        k3, (hidden_dim, output_dim), jnp.float32,
        minval=-1.0, maxval=1.0) * (1.0 / jnp.sqrt(hidden_dim))
    b2 = jax.random.uniform(
        k4, (1, output_dim), jnp.float32,
        minval=-1.0, maxval=1.0) * (1.0 / jnp.sqrt(hidden_dim))
    return w1, b1, w2, b2


if __name__ == "__main__":
    key = jax.random.PRNGKey(0)
    k_x, k_p = jax.random.split(key)

    B = 8                 # small batch
    INPUT_DIM = 1536      # module default
    HIDDEN_DIM = 512
    OUTPUT_DIM = 7

    x = jax.random.normal(k_x, (B, INPUT_DIM), dtype=jnp.float32)
    w1, b1, w2, b2 = init_params(k_p, INPUT_DIM, HIDDEN_DIM, OUTPUT_DIM)

    # One-time parameter prep (hoisted out of the per-call forward path).
    params = prepare_params(w1, b1, w2, b2)

    logits = chunk_classifier_forward(x, params)
    logits = jax.block_until_ready(logits)
    assert logits.shape == (B, OUTPUT_DIM)

    # Pure-JAX reference with the same bf16-rounded operands as the kernel
    # (bf16 inputs/weights, f32 accumulation), inference-mode dropout.
    x_r = x.astype(jnp.bfloat16).astype(jnp.float32)
    w1_r = w1.astype(jnp.bfloat16).astype(jnp.float32)
    h_ref = jnp.maximum(
        jnp.dot(x_r, w1_r, precision=jax.lax.Precision.HIGHEST)
        + b1.reshape(1, HIDDEN_DIM), 0.0)
    h_r = h_ref.astype(jnp.bfloat16).astype(jnp.float32)
    w2_r = w2.astype(jnp.bfloat16).astype(jnp.float32)
    ref = (jnp.dot(h_r, w2_r, precision=jax.lax.Precision.HIGHEST)
           + b2.reshape(1, OUTPUT_DIM))
    assert jnp.allclose(logits, ref, atol=5e-3, rtol=5e-3), (
        float(jnp.max(jnp.abs(logits - ref))))

    print("KERNEL_OK")
</pallas_src>

<mosaic_0001>
module attributes {stable_mosaic.version = 11 : i64} {
  func.func @chunk_classifier_kernel(%arg0: i32, %arg1: memref<8x1536xf32, #tpu.memory_space<vmem>>, %arg2: memref<1536x512xbf16, #tpu.memory_space<vmem>>, %arg3: memref<1x512xf32, #tpu.memory_space<vmem>>, %arg4: memref<512x128xbf16, #tpu.memory_space<vmem>>, %arg5: memref<1x128xf32, #tpu.memory_space<vmem>>, %arg6: memref<8x128xf32, #tpu.memory_space<vmem>>) attributes {dimension_semantics = [#tpu.dimension_semantics<arbitrary>], iteration_bounds = array<i64: 1>, scalar_prefetch = 0 : i64, scratch_operands = 0 : i64, tpu.core_type = #tpu.core_type<tc>, window_params = [{transform_indices = @transform_0, window_bounds = array<i64: 8, 1536>}, {pipeline_mode = #tpu.pipeline_mode<synchronous>, transform_indices = @transform_1, window_bounds = array<i64: 1536, 512>}, {pipeline_mode = #tpu.pipeline_mode<synchronous>, transform_indices = @transform_2, window_bounds = array<i64: 1, 512>}, {pipeline_mode = #tpu.pipeline_mode<synchronous>, transform_indices = @transform_3, window_bounds = array<i64: 512, 128>}, {pipeline_mode = #tpu.pipeline_mode<synchronous>, transform_indices = @transform_4, window_bounds = array<i64: 1, 128>}, {transform_indices = @transform_5, window_bounds = array<i64: 8, 128>}]} {
    %c0 = arith.constant 0 : index
    %c0_0 = arith.constant 0 : index
    %0 = vector.load %arg1[%c0, %c0_0] : memref<8x1536xf32, #tpu.memory_space<vmem>>, vector<8x1536xf32>
    %1 = arith.truncf %0 : vector<8x1536xf32> to vector<8x1536xbf16>
    %c0_1 = arith.constant 0 : index
    %c0_2 = arith.constant 0 : index
    %2 = vector.load %arg2[%c0_1, %c0_2] : memref<1536x512xbf16, #tpu.memory_space<vmem>>, vector<1536x512xbf16>
    %cst = arith.constant dense<0.000000e+00> : vector<8x512xf32>
    %3 = tpu.matmul %1, %2, %cst {dimension_numbers = #tpu.dot_dimension_numbers<[1], [0], [0], [1], [0, 0, 1, 1], [], []>} : vector<8x1536xbf16>, vector<1536x512xbf16>, vector<8x512xf32> -> vector<8x512xf32>
    %c0_3 = arith.constant 0 : index
    %c0_4 = arith.constant 0 : index
    %4 = vector.load %arg3[%c0_3, %c0_4] : memref<1x512xf32, #tpu.memory_space<vmem>>, vector<1x512xf32>
    %5 = vector.broadcast %4 : vector<1x512xf32> to vector<8x512xf32>
    %6 = arith.addf %3, %5 : vector<8x512xf32>
    %cst_5 = arith.constant 0.000000e+00 : f32
    %7 = vector.broadcast %cst_5 : f32 to vector<8x512xf32>
    %8 = arith.maximumf %6, %7 : vector<8x512xf32>
    %9 = arith.truncf %8 : vector<8x512xf32> to vector<8x512xbf16>
    %c0_6 = arith.constant 0 : index
    %c0_7 = arith.constant 0 : index
    %10 = vector.load %arg4[%c0_6, %c0_7] : memref<512x128xbf16, #tpu.memory_space<vmem>>, vector<512x128xbf16>
    %cst_8 = arith.constant dense<0.000000e+00> : vector<8x128xf32>
    %11 = tpu.matmul %9, %10, %cst_8 {dimension_numbers = #tpu.dot_dimension_numbers<[1], [0], [0], [1], [0, 0, 1, 1], [], []>} : vector<8x512xbf16>, vector<512x128xbf16>, vector<8x128xf32> -> vector<8x128xf32>
    %c0_9 = arith.constant 0 : index
    %c0_10 = arith.constant 0 : index
    %12 = vector.load %arg5[%c0_9, %c0_10] : memref<1x128xf32, #tpu.memory_space<vmem>>, vector<1x128xf32>
    %13 = vector.broadcast %12 : vector<1x128xf32> to vector<8x128xf32>
    %14 = arith.addf %11, %13 : vector<8x128xf32>
    %c0_11 = arith.constant 0 : index
    %c0_12 = arith.constant 0 : index
    %15 = vector.load %arg6[%c0_11, %c0_12] : memref<8x128xf32, #tpu.memory_space<vmem>>, vector<8x128xf32>
    tpu.vector_store %arg6[%c0_11, %c0_12], %14 {strides = array<i32>} : memref<8x128xf32, #tpu.memory_space<vmem>>, vector<8x128xf32>,
    return
  }
  func.func @transform_0(%arg0: i32) -> (i32, i32) {
    %c0_i32 = arith.constant 0 : i32
    %c0_i32_0 = arith.constant 0 : i32
    return %arg0, %c0_i32 : i32, i32
  }
  func.func @transform_1(%arg0: i32) -> (i32, i32) {
    %c0_i32 = arith.constant 0 : i32
    %c0_i32_0 = arith.constant 0 : i32
    %c0_i32_1 = arith.constant 0 : i32
    return %c0_i32, %c0_i32_0 : i32, i32
  }
  func.func @transform_2(%arg0: i32) -> (i32, i32) {
    %c0_i32 = arith.constant 0 : i32
    %c0_i32_0 = arith.constant 0 : i32
    %c0_i32_1 = arith.constant 0 : i32
    return %c0_i32, %c0_i32_0 : i32, i32
  }
  func.func @transform_3(%arg0: i32) -> (i32, i32) {
    %c0_i32 = arith.constant 0 : i32
    %c0_i32_0 = arith.constant 0 : i32
    %c0_i32_1 = arith.constant 0 : i32
    return %c0_i32, %c0_i32_0 : i32, i32
  }
  func.func @transform_4(%arg0: i32) -> (i32, i32) {
    %c0_i32 = arith.constant 0 : i32
    %c0_i32_0 = arith.constant 0 : i32
    %c0_i32_1 = arith.constant 0 : i32
    return %c0_i32, %c0_i32_0 : i32, i32
  }
  func.func @transform_5(%arg0: i32) -> (i32, i32) {
    %c0_i32 = arith.constant 0 : i32
    %c0_i32_0 = arith.constant 0 : i32
    return %arg0, %c0_i32 : i32, i32
  }
}

</mosaic_0001>

<bundles_post_ra>
// kernel: tpu_custom_call.1
= control target key start
LH: loop header
LB: loop body
LE: loop exit
PB: predicated region body
PF: predicated region fallthrough
CT: control target
= control target key end

     0   :  { %10 = vsyncpa [#allocation3], 0  ;;  %s5807_s0 = inlined_call_operand.hbm [shape: f32[8,1536], index: 0, kind: input, shape index: {}]   ;;  %s5808_s1 = inlined_call_operand.hbm [shape: bf16[1536,512], index: 1, kind: input, shape index: {}]   ;;  %s5809_s2 = inlined_call_operand.hbm [shape: f32[1,512], index: 2, kind: input, shape index: {}]   ;;  %s5810_s3 = inlined_call_operand.hbm [shape: bf16[512,128], index: 3, kind: input, shape index: {}]   ;;  %s5811_s4 = inlined_call_operand.hbm [shape: f32[1,128], index: 4, kind: input, shape index: {}]   ;;  %s5812_s5 = inlined_call_operand.hbm [shape: f32[8,128], index: 5, kind: output, shape index: {}]  }
   0x1   :  { %11 = vsyncpa [#allocation6], 0 }
   0x2   :  { %12 = vsyncpa [#allocation9], 0  ;;  %s29_s20 = sshll.u32 %s5808_s1, 4  ;;  %s30_s20 = int_to_ptr.hbm [resolvable:$true] %s29_s20 }
   0x3   :  { %13 = vsyncpa [#allocation4], 0  ;;  %s5639_s21 = smov [#allocation5]   ;;  %s53_s25 = sshll.u32 %s5810_s3, 4  ;;  %s54_s25 = int_to_ptr.hbm [resolvable:$true] %s53_s25 }
   0x4   :  { %s31_s22 = sshll.u32 %s5639_s21, 4  ;;  %s5640_s26 = smov 256   ;;  %s32_s22 = int_to_ptr.vmem [resolvable:$true] %s31_s22 }
   0x5   :  { %s5641_s27 = smov 16   ;;  %s5642_s28 = smov [#allocation8]  }
   0x6   :  { %37 = dma.hbm_to_vmem [thread:$0]  %s30_s20, 49152, %s32_s22, [#allocation6], %s5640_s26, %s5640_s26, %s5641_s27  }
   0x7   :  { %s55_s29 = sshll.u32 %s5642_s28, 4  ;;  %s5643_s30 = smov 64   ;;  %s56_s29 = int_to_ptr.vmem [resolvable:$true] %s55_s29 }
   0x8   :  { %s5644_s6 = smov 4   ;;  %s19_s8 = sshll.u32 %s5807_s0, 4  ;;  %s20_s8 = int_to_ptr.hbm [resolvable:$true] %s19_s8 }
   0x9   :  { %61 = dma.hbm_to_vmem [thread:$0]  %s54_s25, 4096, %s56_s29, [#allocation9], %s5643_s30, %s5643_s30, %s5644_s6  }
   0xa   :  { %s5645_s9 = smov [#allocation2]   ;;  %s43_s12 = sshll.u32 %s5809_s2, 4  ;;  %s44_s12 = int_to_ptr.hbm [resolvable:$true] %s43_s12 }
   0xb   :  { %s21_s10 = sshll.u32 %s5645_s9, 4  ;;  %s5646_s13 = smov [#allocation7]   ;;  %s22_s10 = int_to_ptr.vmem [resolvable:$true] %s21_s10 }
   0xc   :  { %24 = dma.hbm_to_vmem [thread:$0]  %s20_s8, 1536, %s22_s10, [#allocation3]  }
   0xd   :  { %s45_s14 = sshll.u32 %s5646_s13, 4  ;;  %s67_s17 = sshll.u32 %s5811_s4, 4  ;;  %s46_s14 = int_to_ptr.vmem [resolvable:$true] %s45_s14  ;;  %s68_s17 = int_to_ptr.hbm [resolvable:$true] %s67_s17 }
   0xe   :  { %48 = dma.hbm_to_vmem [thread:$0]  %s44_s12, 64, %s46_s14, [#allocation6]  }
   0xf   :  { %s5647_s0 = smov [#allocation10]  }
  0x10   :  { %s69_s18 = sshll.u32 %s5647_s0, 4  ;;  %s70_s18 = int_to_ptr.vmem [resolvable:$true] %s69_s18 }
  0x11   :  { %72 = dma.hbm_to_vmem [thread:$0]  %s68_s17, 16, %s70_s18, [#allocation9]  }
  0x12   :  { %5631 = dma.done.wait [#allocation3], 1536  }
  0x13   :  { %5632 = vsyncadd [#allocation3], 4294965760 }
  0x14   :  { %5633 = dma.done.wait [#allocation6], 49216  }
  0x15   :  { %5634 = vsyncadd [#allocation6], 4294918080 }
  0x16   :  { %5635 = dma.done.wait [#allocation9], 4112  }
  0x17   :  { %5636 = vsyncadd [#allocation9], 4294963184  ;;  %v3509_v0 = vld [vmem:[#allocation5 + $0xe0] sm:$0xf]  ;;  %v5089_v1 = vld [vmem:[#allocation5 + $0xec] sm:$0xf0] }
  0x18   :  { %v3637_v2 = vld [vmem:[#allocation5 + $0x1e0] sm:$0xf]  ;;  %v3510_v3 = vor.u32 %v5089_v1, %v3509_v0  ;;  %v5121_v4 = vld [vmem:[#allocation5 + $0x1ec] sm:$0xf0]  ;;  %s5648_s2 = smov [#allocation11]   ;;  %s3383_s21 = sshll.u32 %s5812_s5, 4  ;;  %s3384_s21 = int_to_ptr.hbm [resolvable:$true] %s3383_s21 }
  0x19   :  { %v3765_v5 = vld [vmem:[#allocation5 + $0x2e0] sm:$0xf]  ;;  %v5153_v6 = vld [vmem:[#allocation5 + $0x2ec] sm:$0xf0]  ;;  %v3638_v7 = vor.u32 %v5121_v4, %v3637_v2  ;;  %s3381_s4 = sshll.u32 %s5648_s2, 4  ;;  %s3382_s4 = int_to_ptr.vmem [resolvable:$true] %s3381_s4 }
  0x1a   :  { %v3766_v8 = vor.u32 %v5153_v6, %v3765_v5  ;;  %v3893_v9 = vld [vmem:[#allocation5 + $0x3e0] sm:$0xf]  ;;  %v5185_v10 = vld [vmem:[#allocation5 + $0x3ec] sm:$0xf0]  ;;  %2431 = vmatpush.bf16.msra.mxu0 %v3510_v3 }
  0x1b   :  { %v3493_v11 = vld [vmem:[#allocation5 + $0xc0] sm:$0xf]  ;;  %v3894_v12 = vor.u32 %v5185_v10, %v3893_v9  ;;  %v5085_v13 = vld [vmem:[#allocation5 + $0xcc] sm:$0xf0]  ;;  %2444 = vmatpush.bf16.msra.mxu1 %v3638_v7 }
  0x1c   :  { %v3621_v14 = vld [vmem:[#allocation5 + $0x1c0] sm:$0xf]  ;;  %v5117_v15 = vld [vmem:[#allocation5 + $0x1cc] sm:$0xf0]  ;;  %2457 = vmatpush.bf16.msra.mxu2 %v3766_v8  ;;  %v3494_v16 = vor.u32 %v5085_v13, %v3493_v11 }
  0x1d   :  { %v3622_v17 = vor.u32 %v5117_v15, %v3621_v14  ;;  %v3749_v18 = vld [vmem:[#allocation5 + $0x2c0] sm:$0xf]  ;;  %v5149_v19 = vld [vmem:[#allocation5 + $0x2cc] sm:$0xf0]  ;;  %2470 = vmatpush.bf16.msra.mxu3 %v3894_v12 }
  0x1e   :  { %v3877_v20 = vld [vmem:[#allocation5 + $0x3c0] sm:$0xf]  ;;  %v3750_v21 = vor.u32 %v5149_v19, %v3749_v18  ;;  %v5181_v22 = vld [vmem:[#allocation5 + $0x3cc] sm:$0xf0]  ;;  %2432 = vmatpush.bf16.msra.mxu0 %v3494_v16 }
  0x1f   :  { %v3477_v23 = vld [vmem:[#allocation5 + $0xa0] sm:$0xf]  ;;  %v5081_v24 = vld [vmem:[#allocation5 + $0xac] sm:$0xf0]  ;;  %v3878_v25 = vor.u32 %v5181_v22, %v3877_v20  ;;  %2445 = vmatpush.bf16.msra.mxu1 %v3622_v17 }
  0x20   :  { %v3605_v26 = vld [vmem:[#allocation5 + $0x1a0] sm:$0xf]  ;;  %v5113_v27 = vld [vmem:[#allocation5 + $0x1ac] sm:$0xf0]  ;;  %v3478_v29 = vor.u32 %v5081_v24, %v3477_v23  ;;  %2458 = vmatpush.bf16.msra.mxu2 %v3750_v21 }
  0x21   :  { %v3733_v28 = vld [vmem:[#allocation5 + $0x2a0] sm:$0xf]  ;;  %v5145_v30 = vld [vmem:[#allocation5 + $0x2ac] sm:$0xf0]  ;;  %v3606_v33 = vor.u32 %v5113_v27, %v3605_v26  ;;  %2471 = vmatpush.bf16.msra.mxu3 %v3878_v25 }
  0x22   :  { %v3861_v31 = vld [vmem:[#allocation5 + $0x3a0] sm:$0xf]  ;;  %v5177_v32 = vld [vmem:[#allocation5 + $0x3ac] sm:$0xf0]  ;;  %v3734_v34 = vor.u32 %v5145_v30, %v3733_v28  ;;  %2433 = vmatpush.bf16.msra.mxu0 %v3478_v29 }
  0x23   :  { %v3461_v35 = vld [vmem:[#allocation5 + $0x80] sm:$0xf]  ;;  %v5077_v36 = vld [vmem:[#allocation5 + $0x8c] sm:$0xf0]  ;;  %v3862_v38 = vor.u32 %v5177_v32, %v3861_v31  ;;  %2446 = vmatpush.bf16.msra.mxu1 %v3606_v33 }
  0x24   :  { %v3589_v37 = vld [vmem:[#allocation5 + $0x180] sm:$0xf]  ;;  %v5109_v39 = vld [vmem:[#allocation5 + $0x18c] sm:$0xf0]  ;;  %v3462_v44 = vor.u32 %v5077_v36, %v3461_v35  ;;  %2459 = vmatpush.bf16.msra.mxu2 %v3734_v34 }
  0x25   :  { %v3717_v40 = vld [vmem:[#allocation5 + $0x280] sm:$0xf]  ;;  %v5141_v41 = vld [vmem:[#allocation5 + $0x28c] sm:$0xf0]  ;;  %v3590_v45 = vor.u32 %v5109_v39, %v3589_v37  ;;  %2472 = vmatpush.bf16.msra.mxu3 %v3862_v38 }
  0x26   :  { %v3845_v42 = vld [vmem:[#allocation5 + $0x380] sm:$0xf]  ;;  %v5173_v43 = vld [vmem:[#allocation5 + $0x38c] sm:$0xf0]  ;;  %v3718_v46 = vor.u32 %v5141_v41, %v3717_v40  ;;  %2434 = vmatpush.bf16.msra.mxu0 %v3462_v44 }
  0x27   :  { %v3445_v47 = vld [vmem:[#allocation5 + $0x60] sm:$0xf]  ;;  %v5073_v48 = vld [vmem:[#allocation5 + $0x6c] sm:$0xf0]  ;;  %v3846_v50 = vor.u32 %v5173_v43, %v3845_v42  ;;  %2447 = vmatpush.bf16.msra.mxu1 %v3590_v45 }
  0x28   :  { %v3573_v49 = vld [vmem:[#allocation5 + $0x160] sm:$0xf]  ;;  %v5105_v51 = vld [vmem:[#allocation5 + $0x16c] sm:$0xf0]  ;;  %v3446_v56 = vor.u32 %v5073_v48, %v3445_v47  ;;  %2460 = vmatpush.bf16.msra.mxu2 %v3718_v46 }
  0x29   :  { %v3701_v52 = vld [vmem:[#allocation5 + $0x260] sm:$0xf]  ;;  %v5137_v53 = vld [vmem:[#allocation5 + $0x26c] sm:$0xf0]  ;;  %v3574_v57 = vor.u32 %v5105_v51, %v3573_v49  ;;  %2473 = vmatpush.bf16.msra.mxu3 %v3846_v50 }
  0x2a   :  { %v3829_v54 = vld [vmem:[#allocation5 + $0x360] sm:$0xf]  ;;  %v5169_v55 = vld [vmem:[#allocation5 + $0x36c] sm:$0xf0]  ;;  %v3702_v58 = vor.u32 %v5137_v53, %v3701_v52  ;;  %2435 = vmatpush.bf16.msra.mxu0 %v3446_v56 }
  0x2b   :  { %v3429_v59 = vld [vmem:[#allocation5 + $0x40] sm:$0xf]  ;;  %v5069_v60 = vld [vmem:[#allocation5 + $0x4c] sm:$0xf0]  ;;  %v3830_v62 = vor.u32 %v5169_v55, %v3829_v54  ;;  %2448 = vmatpush.bf16.msra.mxu1 %v3574_v57 }
  0x2c   :  { %v3557_v61 = vld [vmem:[#allocation5 + $0x140] sm:$0xf]  ;;  %v5101_v63 = vld [vmem:[#allocation5 + $0x14c] sm:$0xf0]  ;;  %v3430_v4 = vor.u32 %v5069_v60, %v3429_v59  ;;  %2461 = vmatpush.bf16.msra.mxu2 %v3702_v58 }
  0x2d   :  { %v3685_v0 = vld [vmem:[#allocation5 + $0x240] sm:$0xf]  ;;  %v5133_v1 = vld [vmem:[#allocation5 + $0x24c] sm:$0xf0]  ;;  %v3558_v5 = vor.u32 %v5101_v63, %v3557_v61  ;;  %2474 = vmatpush.bf16.msra.mxu3 %v3830_v62 }
  0x2e   :  { %v3813_v2 = vld [vmem:[#allocation5 + $0x340] sm:$0xf]  ;;  %v5165_v3 = vld [vmem:[#allocation5 + $0x34c] sm:$0xf0]  ;;  %v3686_v6 = vor.u32 %v5133_v1, %v3685_v0  ;;  %2436 = vmatpush.bf16.msra.mxu0 %v3430_v4 }
  0x2f   :  { %v3413_v7 = vld [vmem:[#allocation5 + $0x20] sm:$0xf]  ;;  %v5065_v8 = vld [vmem:[#allocation5 + $0x2c] sm:$0xf0]  ;;  %v3814_v10 = vor.u32 %v5165_v3, %v3813_v2  ;;  %2449 = vmatpush.bf16.msra.mxu1 %v3558_v5 }
  0x30   :  { %v3541_v9 = vld [vmem:[#allocation5 + $0x120] sm:$0xf]  ;;  %v5097_v11 = vld [vmem:[#allocation5 + $0x12c] sm:$0xf0]  ;;  %v3414_v16 = vor.u32 %v5065_v8, %v3413_v7  ;;  %2462 = vmatpush.bf16.msra.mxu2 %v3686_v6 }
  0x31   :  { %v3669_v12 = vld [vmem:[#allocation5 + $0x220] sm:$0xf]  ;;  %v5129_v13 = vld [vmem:[#allocation5 + $0x22c] sm:$0xf0]  ;;  %v3542_v19 = vor.u32 %v5097_v11, %v3541_v9  ;;  %2475 = vmatpush.bf16.msra.mxu3 %v3814_v10  ;;  %v96_v10 = vld [vmem:[#allocation2 + $0x18] sm:$0xff] }
  0x32   :  { %v3797_v14 = vld [vmem:[#allocation5 + $0x320] sm:$0xf]  ;;  %v5161_v15 = vld [vmem:[#allocation5 + $0x32c] sm:$0xf0]  ;;  %v3670_v20 = vor.u32 %v5129_v13, %v3669_v12  ;;  %2437 = vmatpush.bf16.msra.mxu0 %v3414_v16 }
  0x33   :  { %v3397_v17 = vld [vmem:[#allocation5] sm:$0xf]  ;;  %v5061_v18 = vld [vmem:[#allocation5 + $0xc] sm:$0xf0]  ;;  %v3798_v24 = vor.u32 %v5161_v15, %v3797_v14  ;;  %2450 = vmatpush.bf16.msra.mxu1 %v3542_v19  ;;  %v5698_v15 = vpack.c.bf16 %v96_v10, %v96_v10  ;;  %v94_v19 = vld [vmem:[#allocation2 + $0x8] sm:$0xff] }
  0x34   :  { %v3525_v21 = vld [vmem:[#allocation5 + $0x100] sm:$0xf]  ;;  %v5093_v22 = vld [vmem:[#allocation5 + $0x10c] sm:$0xf0]  ;;  %v3398_v31 = vor.u32 %v5061_v18, %v3397_v17  ;;  %2463 = vmatpush.bf16.msra.mxu2 %v3670_v20 }
  0x35   :  { %v3653_v23 = vld [vmem:[#allocation5 + $0x200] sm:$0xf]  ;;  %v5125_v25 = vld [vmem:[#allocation5 + $0x20c] sm:$0xf0]  ;;  %v3526_v35 = vor.u32 %v5093_v22, %v3525_v21  ;;  %2476 = vmatpush.bf16.msra.mxu3 %v3798_v24 }
  0x36   :  { %v3781_v26 = vld [vmem:[#allocation5 + $0x300] sm:$0xf]  ;;  %v5157_v27 = vld [vmem:[#allocation5 + $0x30c] sm:$0xf0]  ;;  %v3654_v36 = vor.u32 %v5125_v25, %v3653_v23  ;;  %2438 = vmatpush.bf16.msra.mxu0 %v3398_v31  ;;  %v5703_v25 = vpack.c.bf16 %v94_v19, %v94_v19 }
  0x37   :  { %v4021_v28 = vld [vmem:[#allocation5 + $0x4e0] sm:$0xf]  ;;  %v5217_v29 = vld [vmem:[#allocation5 + $0x4ec] sm:$0xf0]  ;;  %v3782_v39 = vor.u32 %v5157_v27, %v3781_v26  ;;  %2451 = vmatpush.bf16.msra.mxu1 %v3526_v35 }
  0x38   :  { %v4149_v30 = vld [vmem:[#allocation5 + $0x5e0] sm:$0xf]  ;;  %v5249_v32 = vld [vmem:[#allocation5 + $0x5ec] sm:$0xf0]  ;;  %v4022_v40 = vor.u32 %v5217_v29, %v4021_v28  ;;  %2464 = vmatpush.bf16.msra.mxu2 %v3654_v36 }
  0x39   :  { %v4277_v33 = vld [vmem:[#allocation5 + $0x6e0] sm:$0xf]  ;;  %v5281_v34 = vld [vmem:[#allocation5 + $0x6ec] sm:$0xf0]  ;;  %v4150_v41 = vor.u32 %v5249_v32, %v4149_v30  ;;  %2477 = vmatpush.bf16.msra.mxu3 %v3782_v39 }
  0x3a   :  { %v4405_v37 = vld [vmem:[#allocation5 + $0x7e0] sm:$0xf]  ;;  %v5313_v38 = vld [vmem:[#allocation5 + $0x7ec] sm:$0xf0]  ;;  %v4278_v42 = vor.u32 %v5281_v34, %v4277_v33  ;;  %2483 = vmatpush.bf16.msrb.mxu0 %v4022_v40  ;;  %2452 = vmatmul.bf16.vlgmr.msra.gmra.mxu1 %v5703_v25 }
  0x3b   :  { %v4005_v43 = vld [vmem:[#allocation5 + $0x4c0] sm:$0xf]  ;;  %v5213_v44 = vld [vmem:[#allocation5 + $0x4cc] sm:$0xf0]  ;;  %v4406_v46 = vor.u32 %v5313_v38, %v4405_v37  ;;  %2496 = vmatpush.bf16.msrb.mxu1 %v4150_v41 }
  0x3c   :  { %v4133_v45 = vld [vmem:[#allocation5 + $0x5c0] sm:$0xf]  ;;  %v5245_v47 = vld [vmem:[#allocation5 + $0x5cc] sm:$0xf0]  ;;  %v4006_v52 = vor.u32 %v5213_v44, %v4005_v43  ;;  %2509 = vmatpush.bf16.msrb.mxu2 %v4278_v42  ;;  %2478 = vmatmul.bf16.vlgmr.msra.gmra.mxu3 %v5698_v15 }
  0x3d   :  { %v4261_v48 = vld [vmem:[#allocation5 + $0x6c0] sm:$0xf]  ;;  %v5277_v49 = vld [vmem:[#allocation5 + $0x6cc] sm:$0xf0]  ;;  %v4134_v54 = vor.u32 %v5245_v47, %v4133_v45  ;;  %2522 = vmatpush.bf16.msrb.mxu3 %v4406_v46 }
  0x3e   :  { %v4389_v50 = vld [vmem:[#allocation5 + $0x7c0] sm:$0xf]  ;;  %v5309_v51 = vld [vmem:[#allocation5 + $0x7cc] sm:$0xf0]  ;;  %v4262_v55 = vor.u32 %v5277_v49, %v4261_v48  ;;  %2484 = vmatpush.bf16.msrb.mxu0 %v4006_v52 }
  0x3f   :  { %v3989_v53 = vld [vmem:[#allocation5 + $0x4a0] sm:$0xf]  ;;  %v5209_v56 = vld [vmem:[#allocation5 + $0x4ac] sm:$0xf0]  ;;  %v4390_v59 = vor.u32 %v5309_v51, %v4389_v50  ;;  %2497 = vmatpush.bf16.msrb.mxu1 %v4134_v54 }
  0x40   :  { %v4117_v57 = vld [vmem:[#allocation5 + $0x5a0] sm:$0xf]  ;;  %v5241_v58 = vld [vmem:[#allocation5 + $0x5ac] sm:$0xf0]  ;;  %v3990_v0 = vor.u32 %v5209_v56, %v3989_v53  ;;  %2510 = vmatpush.bf16.msrb.mxu2 %v4262_v55 }
  0x41   :  { %v4245_v60 = vld [vmem:[#allocation5 + $0x6a0] sm:$0xf]  ;;  %v5273_v61 = vld [vmem:[#allocation5 + $0x6ac] sm:$0xf0]  ;;  %v4118_v1 = vor.u32 %v5241_v58, %v4117_v57  ;;  %2523 = vmatpush.bf16.msrb.mxu3 %v4390_v59 }
  0x42   :  { %v4373_v62 = vld [vmem:[#allocation5 + $0x7a0] sm:$0xf]  ;;  %v5305_v63 = vld [vmem:[#allocation5 + $0x7ac] sm:$0xf0]  ;;  %v4246_v5 = vor.u32 %v5273_v61, %v4245_v60  ;;  %2485 = vmatpush.bf16.msrb.mxu0 %v3990_v0 }
  0x43   :  { %v3973_v2 = vld [vmem:[#allocation5 + $0x480] sm:$0xf]  ;;  %v95_v3 = vld [vmem:[#allocation2 + $0x10] sm:$0xff]  ;;  %v4374_v11 = vor.u32 %v5305_v63, %v4373_v62  ;;  %2498 = vmatpush.bf16.msrb.mxu1 %v4118_v1 }
  0x44   :  { %v93_v4 = vld [vmem:[#allocation2] sm:$0xff]  ;;  %v5205_v6 = vld [vmem:[#allocation5 + $0x48c] sm:$0xf0]  ;;  %v5694_v8 = vpack.c.bf16 %v95_v3, %v95_v3  ;;  %2511 = vmatpush.bf16.msrb.mxu2 %v4246_v5 }
  0x45   :  { %v4101_v7 = vld [vmem:[#allocation5 + $0x580] sm:$0xf]  ;;  %v5696_v9 = vpack.c.bf16 %v93_v4, %v93_v4  ;;  %v5237_v12 = vld [vmem:[#allocation5 + $0x58c] sm:$0xf0]  ;;  %v3974_v18 = vor.u32 %v5205_v6, %v3973_v2  ;;  %2524 = vmatpush.bf16.msrb.mxu3 %v4374_v11 }
  0x46   :  { %v4229_v13 = vld [vmem:[#allocation5 + $0x680] sm:$0xf]  ;;  %v5269_v14 = vld [vmem:[#allocation5 + $0x68c] sm:$0xf0]  ;;  %2465 = vmatmul.bf16.vlgmr.msra.gmra.mxu2 %v5694_v8  ;;  %v4102_v20 = vor.u32 %v5237_v12, %v4101_v7 }
  0x47   :  { %v4357_v16 = vld [vmem:[#allocation5 + $0x780] sm:$0xf]  ;;  %v5301_v17 = vld [vmem:[#allocation5 + $0x78c] sm:$0xf0]  ;;  %2439 = vmatmul.bf16.vlgmr.msra.gmra.mxu0 %v5696_v9  ;;  %v4230_v21 = vor.u32 %v5269_v14, %v4229_v13 }
  0x48   :  { %v3957_v22 = vld [vmem:[#allocation5 + $0x460] sm:$0xf]  ;;  %v5201_v23 = vld [vmem:[#allocation5 + $0x46c] sm:$0xf0]  ;;  %v4358_v26 = vor.u32 %v5301_v17, %v4357_v16  ;;  %2486 = vmatpush.bf16.msrb.mxu0 %v3974_v18  ;;  %2499 = vmatpush.bf16.msrb.mxu1 %v4102_v20 }
  0x49   :  { %v4085_v24 = vld [vmem:[#allocation5 + $0x560] sm:$0xf]  ;;  %v5233_v27 = vld [vmem:[#allocation5 + $0x56c] sm:$0xf0]  ;;  %v3958_v32 = vor.u32 %v5201_v23, %v3957_v22  ;;  %2512 = vmatpush.bf16.msrb.mxu2 %v4230_v21  ;;  %v100_v23 = vld [vmem:[#allocation2 + $0x38] sm:$0xff] }
  0x4a   :  { %v4213_v28 = vld [vmem:[#allocation5 + $0x660] sm:$0xf]  ;;  %v5265_v29 = vld [vmem:[#allocation5 + $0x66c] sm:$0xf0]  ;;  %v4086_v33 = vor.u32 %v5233_v27, %v4085_v24  ;;  %2525 = vmatpush.bf16.msrb.mxu3 %v4358_v26 }
  0x4b   :  { %v4341_v30 = vld [vmem:[#allocation5 + $0x760] sm:$0xf]  ;;  %v5297_v31 = vld [vmem:[#allocation5 + $0x76c] sm:$0xf0]  ;;  %v4214_v34 = vor.u32 %v5265_v29, %v4213_v28  ;;  %v98_v29 = vld [vmem:[#allocation2 + $0x28] sm:$0xff] }
  0x4c   :  { %v3941_v35 = vld [vmem:[#allocation5 + $0x440] sm:$0xf]  ;;  %v5197_v36 = vld [vmem:[#allocation5 + $0x44c] sm:$0xf0]  ;;  %v4342_v38 = vor.u32 %v5297_v31, %v4341_v30  ;;  %2487 = vmatpush.bf16.msrb.mxu0 %v3958_v32  ;;  %2500 = vmatpush.bf16.msrb.mxu1 %v4086_v33 }
  0x4d   :  { %v4069_v37 = vld [vmem:[#allocation5 + $0x540] sm:$0xf]  ;;  %v5229_v39 = vld [vmem:[#allocation5 + $0x54c] sm:$0xf0]  ;;  %v3942_v44 = vor.u32 %v5197_v36, %v3941_v35  ;;  %2513 = vmatpush.bf16.msrb.mxu2 %v4214_v34 }
  0x4e   :  { %v4197_v40 = vld [vmem:[#allocation5 + $0x640] sm:$0xf]  ;;  %v5261_v41 = vld [vmem:[#allocation5 + $0x64c] sm:$0xf0]  ;;  %v4070_v45 = vor.u32 %v5229_v39, %v4069_v37  ;;  %2526 = vmatpush.bf16.msrb.mxu3 %v4342_v38  ;;  %v5710_v38 = vpack.c.bf16 %v100_v23, %v100_v23 }
  0x4f   :  { %v4325_v42 = vld [vmem:[#allocation5 + $0x740] sm:$0xf]  ;;  %v5293_v43 = vld [vmem:[#allocation5 + $0x74c] sm:$0xf0]  ;;  %v4198_v46 = vor.u32 %v5261_v41, %v4197_v40  ;;  %v5712_v40 = vpack.c.bf16 %v98_v29, %v98_v29 }
  0x50   :  { %v3925_v47 = vld [vmem:[#allocation5 + $0x420] sm:$0xf]  ;;  %v5193_v48 = vld [vmem:[#allocation5 + $0x42c] sm:$0xf0]  ;;  %v4326_v50 = vor.u32 %v5293_v43, %v4325_v42  ;;  %2488 = vmatpush.bf16.msrb.mxu0 %v3942_v44  ;;  %2501 = vmatpush.bf16.msrb.mxu1 %v4070_v45 }
  0x51   :  { %v4053_v49 = vld [vmem:[#allocation5 + $0x520] sm:$0xf]  ;;  %v5225_v51 = vld [vmem:[#allocation5 + $0x52c] sm:$0xf0]  ;;  %v3926_v56 = vor.u32 %v5193_v48, %v3925_v47  ;;  %2514 = vmatpush.bf16.msrb.mxu2 %v4198_v46 }
  0x52   :  { %v4181_v52 = vld [vmem:[#allocation5 + $0x620] sm:$0xf]  ;;  %v5257_v53 = vld [vmem:[#allocation5 + $0x62c] sm:$0xf0]  ;;  %v4054_v59 = vor.u32 %v5225_v51, %v4053_v49  ;;  %2527 = vmatpush.bf16.msrb.mxu3 %v4326_v50 }
  0x53   :  { %v4309_v54 = vld [vmem:[#allocation5 + $0x720] sm:$0xf]  ;;  %v5289_v55 = vld [vmem:[#allocation5 + $0x72c] sm:$0xf0]  ;;  %v4182_v60 = vor.u32 %v5257_v53, %v4181_v52 }
  0x54   :  { %v3909_v57 = vld [vmem:[#allocation5 + $0x400] sm:$0xf]  ;;  %v5189_v58 = vld [vmem:[#allocation5 + $0x40c] sm:$0xf0]  ;;  %v4310_v0 = vor.u32 %v5289_v55, %v4309_v54  ;;  %2489 = vmatpush.bf16.msrb.mxu0 %v3926_v56  ;;  %2502 = vmatpush.bf16.msrb.mxu1 %v4054_v59 }
  0x55   :  { %v4037_v61 = vld [vmem:[#allocation5 + $0x500] sm:$0xf]  ;;  %v5221_v62 = vld [vmem:[#allocation5 + $0x50c] sm:$0xf0]  ;;  %v3910_v7 = vor.u32 %v5189_v58, %v3909_v57  ;;  %2515 = vmatpush.bf16.msrb.mxu2 %v4182_v60 }
  0x56   :  { %v4165_v63 = vld [vmem:[#allocation5 + $0x600] sm:$0xf]  ;;  %v5253_v1 = vld [vmem:[#allocation5 + $0x60c] sm:$0xf0]  ;;  %v4038_v13 = vor.u32 %v5221_v62, %v4037_v61  ;;  %2528 = vmatpush.bf16.msrb.mxu3 %v4310_v0 }
  0x57   :  { %v4293_v2 = vld [vmem:[#allocation5 + $0x700] sm:$0xf]  ;;  %v5285_v3 = vld [vmem:[#allocation5 + $0x70c] sm:$0xf0]  ;;  %v4166_v14 = vor.u32 %v5253_v1, %v4165_v63 }
  0x58   :  { %v4533_v4 = vld [vmem:[#allocation5 + $0x8e0] sm:$0xf]  ;;  %v5345_v5 = vld [vmem:[#allocation5 + $0x8ec] sm:$0xf0]  ;;  %v4294_v19 = vor.u32 %v5285_v3, %v4293_v2  ;;  %2490 = vmatpush.bf16.msrb.mxu0 %v3910_v7  ;;  %2503 = vmatpush.bf16.msrb.mxu1 %v4038_v13 }
  0x59   :  { %v4661_v6 = vld [vmem:[#allocation5 + $0x9e0] sm:$0xf]  ;;  %v5377_v10 = vld [vmem:[#allocation5 + $0x9ec] sm:$0xf0]  ;;  %v4534_v20 = vor.u32 %v5345_v5, %v4533_v4  ;;  %2516 = vmatpush.bf16.msrb.mxu2 %v4166_v14 }
  0x5a   :  { %v4789_v11 = vld [vmem:[#allocation5 + $0xae0] sm:$0xf]  ;;  %v5409_v12 = vld [vmem:[#allocation5 + $0xaec] sm:$0xf0]  ;;  %v4662_v24 = vor.u32 %v5377_v10, %v4661_v6  ;;  %2529 = vmatpush.bf16.msrb.mxu3 %v4294_v19 }
  0x5b   :  { %v4917_v16 = vld [vmem:[#allocation5 + $0xbe0] sm:$0xf]  ;;  %v5441_v17 = vld [vmem:[#allocation5 + $0xbec] sm:$0xf0]  ;;  %v4790_v26 = vor.u32 %v5409_v12, %v4789_v11  ;;  %2504 = vmatmul.bf16.vlgmr.msrb.gmra.mxu1 %v5712_v40 }
  0x5c   :  { %v99_v18 = vld [vmem:[#allocation2 + $0x30] sm:$0xff]  ;;  %v4517_v21 = vld [vmem:[#allocation5 + $0x8c0] sm:$0xf]  ;;  %v4918_v30 = vor.u32 %v5441_v17, %v4917_v16  ;;  %2535 = vmatpush.bf16.msra.mxu0 %v4534_v20  ;;  %2548 = vmatpush.bf16.msra.mxu1 %v4662_v24 }
  0x5d   :  { %v97_v22 = vld [vmem:[#allocation2 + $0x20] sm:$0xff]  ;;  %v5341_v27 = vld [vmem:[#allocation5 + $0x8cc] sm:$0xf0]  ;;  %v5706_v34 = vpack.c.bf16 %v99_v18, %v99_v18  ;;  %2561 = vmatpush.bf16.msra.mxu2 %v4790_v26  ;;  %2530 = vmatmul.bf16.vlgmr.msrb.gmra.mxu3 %v5710_v38 }
  0x5e   :  { %v4645_v28 = vld [vmem:[#allocation5 + $0x9c0] sm:$0xf]  ;;  %v5373_v31 = vld [vmem:[#allocation5 + $0x9cc] sm:$0xf0]  ;;  %v5708_v37 = vpack.c.bf16 %v97_v22, %v97_v22  ;;  %v4518_v39 = vor.u32 %v5341_v27, %v4517_v21  ;;  %2574 = vmatpush.bf16.msra.mxu3 %v4918_v30 }
  0x5f   :  { %v4773_v32 = vld [vmem:[#allocation5 + $0xac0] sm:$0xf]  ;;  %v5405_v33 = vld [vmem:[#allocation5 + $0xacc] sm:$0xf0]  ;;  %v4646_v41 = vor.u32 %v5373_v31, %v4645_v28  ;;  %2517 = vmatmul.bf16.vlgmr.msrb.gmra.mxu2 %v5706_v34 }
  0x60   :  { %v4901_v35 = vld [vmem:[#allocation5 + $0xbc0] sm:$0xf]  ;;  %v5437_v36 = vld [vmem:[#allocation5 + $0xbcc] sm:$0xf0]  ;;  %v4774_v42 = vor.u32 %v5405_v33, %v4773_v32  ;;  %2491 = vmatmul.bf16.vlgmr.msrb.gmra.mxu0 %v5708_v37 }
  0x61   :  { %v4501_v43 = vld [vmem:[#allocation5 + $0x8a0] sm:$0xf]  ;;  %v5337_v44 = vld [vmem:[#allocation5 + $0x8ac] sm:$0xf0]  ;;  %v4902_v46 = vor.u32 %v5437_v36, %v4901_v35  ;;  %2536 = vmatpush.bf16.msra.mxu0 %v4518_v39  ;;  %2549 = vmatpush.bf16.msra.mxu1 %v4646_v41 }
  0x62   :  { %v4629_v45 = vld [vmem:[#allocation5 + $0x9a0] sm:$0xf]  ;;  %v5369_v47 = vld [vmem:[#allocation5 + $0x9ac] sm:$0xf0]  ;;  %v4502_v52 = vor.u32 %v5337_v44, %v4501_v43  ;;  %2562 = vmatpush.bf16.msra.mxu2 %v4774_v42 }
  0x63   :  { %v4757_v48 = vld [vmem:[#allocation5 + $0xaa0] sm:$0xf]  ;;  %v5401_v49 = vld [vmem:[#allocation5 + $0xaac] sm:$0xf0]  ;;  %v4630_v53 = vor.u32 %v5369_v47, %v4629_v45  ;;  %2575 = vmatpush.bf16.msra.mxu3 %v4902_v46 }
  0x64   :  { %v4885_v50 = vld [vmem:[#allocation5 + $0xba0] sm:$0xf]  ;;  %v5433_v51 = vld [vmem:[#allocation5 + $0xbac] sm:$0xf0]  ;;  %v4758_v54 = vor.u32 %v5401_v49, %v4757_v48 }
  0x65   :  { %v4485_v55 = vld [vmem:[#allocation5 + $0x880] sm:$0xf]  ;;  %v5333_v56 = vld [vmem:[#allocation5 + $0x88c] sm:$0xf0]  ;;  %v4886_v58 = vor.u32 %v5433_v51, %v4885_v50  ;;  %2537 = vmatpush.bf16.msra.mxu0 %v4502_v52  ;;  %2550 = vmatpush.bf16.msra.mxu1 %v4630_v53 }
  0x66   :  { %v4613_v57 = vld [vmem:[#allocation5 + $0x980] sm:$0xf]  ;;  %v5365_v59 = vld [vmem:[#allocation5 + $0x98c] sm:$0xf0]  ;;  %v4486_v0 = vor.u32 %v5333_v56, %v4485_v55  ;;  %2563 = vmatpush.bf16.msra.mxu2 %v4758_v54  ;;  %v5087_v56 = vld [vmem:[#allocation5 + $0xe4] sm:$0xf] }
  0x67   :  { %v4741_v60 = vld [vmem:[#allocation5 + $0xa80] sm:$0xf]  ;;  %v5397_v61 = vld [vmem:[#allocation5 + $0xa8c] sm:$0xf0]  ;;  %v4614_v1 = vor.u32 %v5365_v59, %v4613_v57  ;;  %2576 = vmatpush.bf16.msra.mxu3 %v4886_v58  ;;  %v3511_v57 = vld [vmem:[#allocation5 + $0xf0] sm:$0xf0] }
  0x68   :  { %v4869_v62 = vld [vmem:[#allocation5 + $0xb80] sm:$0xf]  ;;  %v5429_v63 = vld [vmem:[#allocation5 + $0xb8c] sm:$0xf0]  ;;  %v4742_v2 = vor.u32 %v5397_v61, %v4741_v60  ;;  %v5119_v58 = vld [vmem:[#allocation5 + $0x1e4] sm:$0xf] }
  0x69   :  { %v4469_v3 = vld [vmem:[#allocation5 + $0x860] sm:$0xf]  ;;  %v5329_v4 = vld [vmem:[#allocation5 + $0x86c] sm:$0xf0]  ;;  %v4870_v6 = vor.u32 %v5429_v63, %v4869_v62  ;;  %2538 = vmatpush.bf16.msra.mxu0 %v4486_v0  ;;  %2551 = vmatpush.bf16.msra.mxu1 %v4614_v1  ;;  %v3639_v60 = vld [vmem:[#allocation5 + $0x1f0] sm:$0xf0] }
  0x6a   :  { %v4597_v5 = vld [vmem:[#allocation5 + $0x960] sm:$0xf]  ;;  %v5361_v7 = vld [vmem:[#allocation5 + $0x96c] sm:$0xf0]  ;;  %v4470_v14 = vor.u32 %v5329_v4, %v4469_v3  ;;  %2564 = vmatpush.bf16.msra.mxu2 %v4742_v2  ;;  %v5151_v61 = vld [vmem:[#allocation5 + $0x2e4] sm:$0xf] }
  0x6b   :  { %v4725_v10 = vld [vmem:[#allocation5 + $0xa60] sm:$0xf]  ;;  %v5393_v11 = vld [vmem:[#allocation5 + $0xa6c] sm:$0xf0]  ;;  %v4598_v16 = vor.u32 %v5361_v7, %v4597_v5  ;;  %2577 = vmatpush.bf16.msra.mxu3 %v4870_v6  ;;  %v3767_v62 = vld [vmem:[#allocation5 + $0x2f0] sm:$0xf0]  ;;  %v3514_v5 = vor.u32 %v5087_v56, %v3511_v57 }
  0x6c   :  { %v4853_v12 = vld [vmem:[#allocation5 + $0xb60] sm:$0xf]  ;;  %v5425_v13 = vld [vmem:[#allocation5 + $0xb6c] sm:$0xf0]  ;;  %v4726_v17 = vor.u32 %v5393_v11, %v4725_v10  ;;  %v5183_v1 = vld [vmem:[#allocation5 + $0x3e4] sm:$0xf]  ;;  %v3642_v11 = vor.u32 %v5119_v58, %v3639_v60 }
  0x6d   :  { %v4453_v18 = vld [vmem:[#allocation5 + $0x840] sm:$0xf]  ;;  %v5325_v19 = vld [vmem:[#allocation5 + $0x84c] sm:$0xf0]  ;;  %v4854_v21 = vor.u32 %v5425_v13, %v4853_v12  ;;  %2539 = vmatpush.bf16.msra.mxu0 %v4470_v14  ;;  %2552 = vmatpush.bf16.msra.mxu1 %v4598_v16  ;;  %v3895_v2 = vld [vmem:[#allocation5 + $0x3f0] sm:$0xf0]  ;;  %v3770_v12 = vor.u32 %v5151_v61, %v3767_v62 }
  0x6e   :  { %v4581_v20 = vld [vmem:[#allocation5 + $0x940] sm:$0xf]  ;;  %v5357_v22 = vld [vmem:[#allocation5 + $0x94c] sm:$0xf0]  ;;  %v4454_v28 = vor.u32 %v5325_v19, %v4453_v18  ;;  %2565 = vmatpush.bf16.msra.mxu2 %v4726_v17  ;;  %v102_v7 = vld [vmem:[#allocation2 + $0x48] sm:$0xff]  ;;  %v3898_v17 = vor.u32 %v5183_v1, %v3895_v2 }
  0x6f   :  { %v4709_v23 = vld [vmem:[#allocation5 + $0xa40] sm:$0xf]  ;;  %v5389_v24 = vld [vmem:[#allocation5 + $0xa4c] sm:$0xf0]  ;;  %v4582_v29 = vor.u32 %v5357_v22, %v4581_v20  ;;  %2578 = vmatpush.bf16.msra.mxu3 %v4854_v21  ;;  %v104_v10 = vld [vmem:[#allocation2 + $0x58] sm:$0xff] }
  0x70   :  { %v4837_v26 = vld [vmem:[#allocation5 + $0xb40] sm:$0xf]  ;;  %v5421_v27 = vld [vmem:[#allocation5 + $0xb4c] sm:$0xf0]  ;;  %v4710_v30 = vor.u32 %v5389_v24, %v4709_v23  ;;  %v5083_v13 = vld [vmem:[#allocation5 + $0xc4] sm:$0xf]  ;;  %v5722_v23 = vpack.c.bf16 %v102_v7, %v102_v7 }
  0x71   :  { %v4437_v31 = vld [vmem:[#allocation5 + $0x820] sm:$0xf]  ;;  %v5321_v32 = vld [vmem:[#allocation5 + $0x82c] sm:$0xf0]  ;;  %v4838_v35 = vor.u32 %v5421_v27, %v4837_v26  ;;  %2540 = vmatpush.bf16.msra.mxu0 %v4454_v28  ;;  %2553 = vmatpush.bf16.msra.mxu1 %v4582_v29  ;;  %v3495_v14 = vld [vmem:[#allocation5 + $0xd0] sm:$0xf0]  ;;  %v5724_v27 = vpack.c.bf16 %v104_v10, %v104_v10 }
  0x72   :  { %v4565_v33 = vld [vmem:[#allocation5 + $0x920] sm:$0xf]  ;;  %v5353_v36 = vld [vmem:[#allocation5 + $0x92c] sm:$0xf0]  ;;  %v4438_v44 = vor.u32 %v5321_v32, %v4437_v31  ;;  %2566 = vmatpush.bf16.msra.mxu2 %v4710_v30  ;;  %v5115_v16 = vld [vmem:[#allocation5 + $0x1c4] sm:$0xf]  ;;  %v3498_v28 = vor.u32 %v5083_v13, %v3495_v14 }
  0x73   :  { %v4693_v39 = vld [vmem:[#allocation5 + $0xa20] sm:$0xf]  ;;  %v5385_v41 = vld [vmem:[#allocation5 + $0xa2c] sm:$0xf0]  ;;  %v4566_v48 = vor.u32 %v5353_v36, %v4565_v33  ;;  %2579 = vmatpush.bf16.msra.mxu3 %v4838_v35  ;;  %v3623_v19 = vld [vmem:[#allocation5 + $0x1d0] sm:$0xf0] }
  0x74   :  { %v4821_v42 = vld [vmem:[#allocation5 + $0xb20] sm:$0xf]  ;;  %v5417_v43 = vld [vmem:[#allocation5 + $0xb2c] sm:$0xf0]  ;;  %v4694_v49 = vor.u32 %v5385_v41, %v4693_v39  ;;  %v5147_v20 = vld [vmem:[#allocation5 + $0x2c4] sm:$0xf]  ;;  %v3626_v29 = vor.u32 %v5115_v16, %v3623_v19 }
  0x75   :  { %v4421_v45 = vld [vmem:[#allocation5 + $0x800] sm:$0xf]  ;;  %v5317_v46 = vld [vmem:[#allocation5 + $0x80c] sm:$0xf0]  ;;  %v4822_v53 = vor.u32 %v5417_v43, %v4821_v42  ;;  %2541 = vmatpush.bf16.msra.mxu0 %v4438_v44  ;;  %2554 = vmatpush.bf16.msra.mxu1 %v4566_v48  ;;  %v3751_v21 = vld [vmem:[#allocation5 + $0x2d0] sm:$0xf0] }
  0x76   :  { %v4549_v47 = vld [vmem:[#allocation5 + $0x900] sm:$0xf]  ;;  %v5349_v50 = vld [vmem:[#allocation5 + $0x90c] sm:$0xf0]  ;;  %v4422_v59 = vor.u32 %v5317_v46, %v4421_v45  ;;  %2567 = vmatpush.bf16.msra.mxu2 %v4694_v49  ;;  %v5179_v24 = vld [vmem:[#allocation5 + $0x3c4] sm:$0xf]  ;;  %v3754_v30 = vor.u32 %v5147_v20, %v3751_v21 }
  0x77   :  { %v4677_v51 = vld [vmem:[#allocation5 + $0xa00] sm:$0xf]  ;;  %v5381_v52 = vld [vmem:[#allocation5 + $0xa0c] sm:$0xf0]  ;;  %v4550_v63 = vor.u32 %v5349_v50, %v4549_v47  ;;  %2580 = vmatpush.bf16.msra.mxu3 %v4822_v53  ;;  %v3879_v26 = vld [vmem:[#allocation5 + $0x3d0] sm:$0xf0] }
  0x78   :  { %v4805_v54 = vld [vmem:[#allocation5 + $0xb00] sm:$0xf]  ;;  %v5413_v55 = vld [vmem:[#allocation5 + $0xb0c] sm:$0xf0]  ;;  %v4678_v0 = vor.u32 %v5381_v52, %v4677_v51  ;;  %v5079_v31 = vld [vmem:[#allocation5 + $0xa4] sm:$0xf]  ;;  %v3882_v35 = vor.u32 %v5179_v24, %v3879_v26 }
  0x79   :  { %v101_v3 = vld [vmem:[#allocation2 + $0x40] sm:$0xff]  ;;  %v4806_v4 = vor.u32 %v5413_v55, %v4805_v54  ;;  %v103_v6 = vld [vmem:[#allocation2 + $0x50] sm:$0xff]  ;;  %2542 = vmatpush.bf16.msra.mxu0 %v4422_v59  ;;  %2555 = vmatpush.bf16.msra.mxu1 %v4550_v63 }
  0x7a   :  { %v5718_v18 = vpack.c.bf16 %v101_v3, %v101_v3  ;;  %2568 = vmatpush.bf16.msra.mxu2 %v4678_v0  ;;  %v5720_v22 = vpack.c.bf16 %v103_v6, %v103_v6  ;;  %v3479_v32 = vld [vmem:[#allocation5 + $0xb0] sm:$0xf0]  ;;  %v5111_v33 = vld [vmem:[#allocation5 + $0x1a4] sm:$0xf] }
  0x7b   :  { %2581 = vmatpush.bf16.msra.mxu3 %v4806_v4  ;;  %v3607_v36 = vld [vmem:[#allocation5 + $0x1b0] sm:$0xf0]  ;;  %v5143_v39 = vld [vmem:[#allocation5 + $0x2a4] sm:$0xf]  ;;  %v3482_v44 = vor.u32 %v5079_v31, %v3479_v32 }
  0x7c   :  { %2543 = vmatmul.bf16.vlgmr.msra.gmra.mxu0 %v5718_v18  ;;  %v3735_v41 = vld [vmem:[#allocation5 + $0x2b0] sm:$0xf0]  ;;  %2556 = vmatmul.bf16.vlgmr.msra.gmra.mxu1 %v5722_v23  ;;  %v5175_v42 = vld [vmem:[#allocation5 + $0x3a4] sm:$0xf]  ;;  %v3610_v45 = vor.u32 %v5111_v33, %v3607_v36 }
  0x7d   :  { %2587 = vmatpush.bf16.msrb.mxu0 %v3514_v5  ;;  %2600 = vmatpush.bf16.msrb.mxu1 %v3642_v11  ;;  %v3863_v43 = vld [vmem:[#allocation5 + $0x3b0] sm:$0xf0]  ;;  %v3738_v46 = vor.u32 %v5143_v39, %v3735_v41  ;;  %v5075_v47 = vld [vmem:[#allocation5 + $0x84] sm:$0xf] }
  0x7e   :  { %2613 = vmatpush.bf16.msrb.mxu2 %v3770_v12  ;;  %2582 = vmatmul.bf16.vlgmr.msra.gmra.mxu3 %v5724_v27  ;;  %v3463_v48 = vld [vmem:[#allocation5 + $0x90] sm:$0xf0]  ;;  %v5107_v49 = vld [vmem:[#allocation5 + $0x184] sm:$0xf]  ;;  %v3866_v50 = vor.u32 %v5175_v42, %v3863_v43 }
  0x7f   :  { %2626 = vmatpush.bf16.msrb.mxu3 %v3898_v17  ;;  %2569 = vmatmul.bf16.vlgmr.msra.gmra.mxu2 %v5720_v22  ;;  %v3591_v51 = vld [vmem:[#allocation5 + $0x190] sm:$0xf0]  ;;  %v5139_v52 = vld [vmem:[#allocation5 + $0x284] sm:$0xf]  ;;  %v3466_v56 = vor.u32 %v5075_v47, %v3463_v48 }
  0x80   :  { %v3719_v53 = vld [vmem:[#allocation5 + $0x290] sm:$0xf0]  ;;  %v5171_v54 = vld [vmem:[#allocation5 + $0x384] sm:$0xf]  ;;  %v3594_v57 = vor.u32 %v5107_v49, %v3591_v51 }
  0x81   :  { %2588 = vmatpush.bf16.msrb.mxu0 %v3498_v28  ;;  %2601 = vmatpush.bf16.msrb.mxu1 %v3626_v29  ;;  %v3847_v55 = vld [vmem:[#allocation5 + $0x390] sm:$0xf0]  ;;  %v3722_v58 = vor.u32 %v5139_v52, %v3719_v53  ;;  %v5071_v59 = vld [vmem:[#allocation5 + $0x64] sm:$0xf] }
  0x82   :  { %2614 = vmatpush.bf16.msrb.mxu2 %v3754_v30  ;;  %v3447_v60 = vld [vmem:[#allocation5 + $0x70] sm:$0xf0]  ;;  %v5103_v61 = vld [vmem:[#allocation5 + $0x164] sm:$0xf]  ;;  %v3850_v62 = vor.u32 %v5171_v54, %v3847_v55 }
  0x83   :  { %2627 = vmatpush.bf16.msrb.mxu3 %v3882_v35  ;;  %v3575_v63 = vld [vmem:[#allocation5 + $0x170] sm:$0xf0]  ;;  %v5135_v0 = vld [vmem:[#allocation5 + $0x264] sm:$0xf]  ;;  %v3450_v4 = vor.u32 %v5071_v59, %v3447_v60 }
  0x84   :  { %v3703_v1 = vld [vmem:[#allocation5 + $0x270] sm:$0xf0]  ;;  %v5167_v2 = vld [vmem:[#allocation5 + $0x364] sm:$0xf]  ;;  %v3578_v5 = vor.u32 %v5103_v61, %v3575_v63 }
  0x85   :  { %2589 = vmatpush.bf16.msrb.mxu0 %v3482_v44  ;;  %2602 = vmatpush.bf16.msrb.mxu1 %v3610_v45  ;;  %v3831_v3 = vld [vmem:[#allocation5 + $0x370] sm:$0xf0]  ;;  %v3706_v6 = vor.u32 %v5135_v0, %v3703_v1  ;;  %v5067_v7 = vld [vmem:[#allocation5 + $0x44] sm:$0xf] }
  0x86   :  { %2615 = vmatpush.bf16.msrb.mxu2 %v3738_v46  ;;  %v3431_v10 = vld [vmem:[#allocation5 + $0x50] sm:$0xf0]  ;;  %v5099_v11 = vld [vmem:[#allocation5 + $0x144] sm:$0xf]  ;;  %v3834_v12 = vor.u32 %v5167_v2, %v3831_v3 }
  0x87   :  { %2628 = vmatpush.bf16.msrb.mxu3 %v3866_v50  ;;  %v3559_v13 = vld [vmem:[#allocation5 + $0x150] sm:$0xf0]  ;;  %v5131_v14 = vld [vmem:[#allocation5 + $0x244] sm:$0xf]  ;;  %v3434_v20 = vor.u32 %v5067_v7, %v3431_v10 }
  0x88   :  { %v3687_v16 = vld [vmem:[#allocation5 + $0x250] sm:$0xf0]  ;;  %v5163_v17 = vld [vmem:[#allocation5 + $0x344] sm:$0xf]  ;;  %v3562_v21 = vor.u32 %v5099_v11, %v3559_v13 }
  0x89   :  { %2590 = vmatpush.bf16.msrb.mxu0 %v3466_v56  ;;  %2603 = vmatpush.bf16.msrb.mxu1 %v3594_v57  ;;  %v3815_v19 = vld [vmem:[#allocation5 + $0x350] sm:$0xf0]  ;;  %v3690_v24 = vor.u32 %v5131_v14, %v3687_v16  ;;  %v5063_v26 = vld [vmem:[#allocation5 + $0x24] sm:$0xf] }
  0x8a   :  { %2616 = vmatpush.bf16.msrb.mxu2 %v3722_v58  ;;  %v3415_v28 = vld [vmem:[#allocation5 + $0x30] sm:$0xf0]  ;;  %v5095_v29 = vld [vmem:[#allocation5 + $0x124] sm:$0xf]  ;;  %v3818_v30 = vor.u32 %v5163_v17, %v3815_v19 }
  0x8b   :  { %2629 = vmatpush.bf16.msrb.mxu3 %v3850_v62  ;;  %v3543_v31 = vld [vmem:[#allocation5 + $0x130] sm:$0xf0]  ;;  %v5127_v32 = vld [vmem:[#allocation5 + $0x224] sm:$0xf]  ;;  %v3418_v39 = vor.u32 %v5063_v26, %v3415_v28 }
  0x8c   :  { %v3671_v33 = vld [vmem:[#allocation5 + $0x230] sm:$0xf0]  ;;  %v5159_v35 = vld [vmem:[#allocation5 + $0x324] sm:$0xf]  ;;  %v3546_v43 = vor.u32 %v5095_v29, %v3543_v31 }
  0x8d   :  { %2591 = vmatpush.bf16.msrb.mxu0 %v3450_v4  ;;  %2604 = vmatpush.bf16.msrb.mxu1 %v3578_v5  ;;  %v3799_v36 = vld [vmem:[#allocation5 + $0x330] sm:$0xf0]  ;;  %v5059_v41 = vld [vmem:[#allocation5 + $0x4] sm:$0xf]  ;;  %v3674_v44 = vor.u32 %v5127_v32, %v3671_v33 }
  0x8e   :  { %2617 = vmatpush.bf16.msrb.mxu2 %v3706_v6  ;;  %v3399_v42 = vld [vmem:[#allocation5 + $0x10] sm:$0xf0]  ;;  %v5091_v45 = vld [vmem:[#allocation5 + $0x104] sm:$0xf]  ;;  %v3802_v48 = vor.u32 %v5159_v35, %v3799_v36 }
  0x8f   :  { %2630 = vmatpush.bf16.msrb.mxu3 %v3834_v12  ;;  %v3527_v46 = vld [vmem:[#allocation5 + $0x110] sm:$0xf0]  ;;  %v5123_v47 = vld [vmem:[#allocation5 + $0x204] sm:$0xf]  ;;  %v3402_v55 = vor.u32 %v5059_v41, %v3399_v42 }
  0x90   :  { %v3655_v49 = vld [vmem:[#allocation5 + $0x210] sm:$0xf0]  ;;  %v5155_v50 = vld [vmem:[#allocation5 + $0x304] sm:$0xf]  ;;  %v3530_v59 = vor.u32 %v5091_v45, %v3527_v46 }
  0x91   :  { %2592 = vmatpush.bf16.msrb.mxu0 %v3434_v20  ;;  %2605 = vmatpush.bf16.msrb.mxu1 %v3562_v21  ;;  %v3783_v51 = vld [vmem:[#allocation5 + $0x310] sm:$0xf0]  ;;  %v5215_v52 = vld [vmem:[#allocation5 + $0x4e4] sm:$0xf]  ;;  %v3658_v60 = vor.u32 %v5123_v47, %v3655_v49 }
  0x92   :  { %2618 = vmatpush.bf16.msrb.mxu2 %v3690_v24  ;;  %v4023_v53 = vld [vmem:[#allocation5 + $0x4f0] sm:$0xf0]  ;;  %v5247_v54 = vld [vmem:[#allocation5 + $0x5e4] sm:$0xf]  ;;  %v3786_v63 = vor.u32 %v5155_v50, %v3783_v51 }
  0x93   :  { %2631 = vmatpush.bf16.msrb.mxu3 %v3818_v30  ;;  %v4151_v56 = vld [vmem:[#allocation5 + $0x5f0] sm:$0xf0]  ;;  %v5279_v57 = vld [vmem:[#allocation5 + $0x6e4] sm:$0xf]  ;;  %v4026_v0 = vor.u32 %v5215_v52, %v4023_v53 }
  0x94   :  { %v4279_v58 = vld [vmem:[#allocation5 + $0x6f0] sm:$0xf0]  ;;  %v5311_v61 = vld [vmem:[#allocation5 + $0x7e4] sm:$0xf]  ;;  %v4154_v1 = vor.u32 %v5247_v54, %v4151_v56 }
  0x95   :  { %2593 = vmatpush.bf16.msrb.mxu0 %v3418_v39  ;;  %2606 = vmatpush.bf16.msrb.mxu1 %v3546_v43  ;;  %v4407_v62 = vld [vmem:[#allocation5 + $0x7f0] sm:$0xf0]  ;;  %v4282_v2 = vor.u32 %v5279_v57, %v4279_v58  ;;  %v5211_v3 = vld [vmem:[#allocation5 + $0x4c4] sm:$0xf] }
  0x96   :  { %2619 = vmatpush.bf16.msrb.mxu2 %v3674_v44  ;;  %v4007_v4 = vld [vmem:[#allocation5 + $0x4d0] sm:$0xf0]  ;;  %v5243_v5 = vld [vmem:[#allocation5 + $0x5c4] sm:$0xf]  ;;  %v4410_v6 = vor.u32 %v5311_v61, %v4407_v62 }
  0x97   :  { %2632 = vmatpush.bf16.msrb.mxu3 %v3802_v48  ;;  %v4135_v7 = vld [vmem:[#allocation5 + $0x5d0] sm:$0xf0]  ;;  %v5275_v10 = vld [vmem:[#allocation5 + $0x6c4] sm:$0xf]  ;;  %v4010_v14 = vor.u32 %v5211_v3, %v4007_v4 }
  0x98   :  { %v4263_v11 = vld [vmem:[#allocation5 + $0x6d0] sm:$0xf0]  ;;  %v5307_v12 = vld [vmem:[#allocation5 + $0x7c4] sm:$0xf]  ;;  %v4138_v16 = vor.u32 %v5243_v5, %v4135_v7 }
  0x99   :  { %2594 = vmatpush.bf16.msrb.mxu0 %v3402_v55  ;;  %2607 = vmatpush.bf16.msrb.mxu1 %v3530_v59  ;;  %v4391_v13 = vld [vmem:[#allocation5 + $0x7d0] sm:$0xf0]  ;;  %v4266_v17 = vor.u32 %v5275_v10, %v4263_v11  ;;  %v5207_v19 = vld [vmem:[#allocation5 + $0x4a4] sm:$0xf] }
  0x9a   :  { %2620 = vmatpush.bf16.msrb.mxu2 %v3658_v60  ;;  %v3991_v20 = vld [vmem:[#allocation5 + $0x4b0] sm:$0xf0]  ;;  %v5239_v21 = vld [vmem:[#allocation5 + $0x5a4] sm:$0xf]  ;;  %v4394_v24 = vor.u32 %v5307_v12, %v4391_v13 }
  0x9b   :  { %2633 = vmatpush.bf16.msrb.mxu3 %v3786_v63  ;;  %v4119_v26 = vld [vmem:[#allocation5 + $0x5b0] sm:$0xf0]  ;;  %v5271_v28 = vld [vmem:[#allocation5 + $0x6a4] sm:$0xf]  ;;  %v3994_v32 = vor.u32 %v5207_v19, %v3991_v20 }
  0x9c   :  { %v4247_v29 = vld [vmem:[#allocation5 + $0x6b0] sm:$0xf0]  ;;  %v5303_v30 = vld [vmem:[#allocation5 + $0x7a4] sm:$0xf]  ;;  %2595 = vmatmul.bf16.vlgmr.msrb.gmra.mxu0 %v5696_v9  ;;  %2608 = vmatmul.bf16.vlgmr.msrb.gmra.mxu1 %v5703_v25  ;;  %v4122_v33 = vor.u32 %v5239_v21, %v4119_v26 }
  0x9d   :  { %2639 = vmatpush.bf16.msra.mxu0 %v4026_v0  ;;  %2652 = vmatpush.bf16.msra.mxu1 %v4154_v1  ;;  %v4375_v31 = vld [vmem:[#allocation5 + $0x7b0] sm:$0xf0]  ;;  %v4250_v35 = vor.u32 %v5271_v28, %v4247_v29  ;;  %v5203_v36 = vld [vmem:[#allocation5 + $0x484] sm:$0xf] }
  0x9e   :  { %2665 = vmatpush.bf16.msra.mxu2 %v4282_v2  ;;  %2634 = vmatmul.bf16.vlgmr.msrb.gmra.mxu3 %v5698_v15  ;;  %v3975_v39 = vld [vmem:[#allocation5 + $0x490] sm:$0xf0]  ;;  %v5235_v41 = vld [vmem:[#allocation5 + $0x584] sm:$0xf]  ;;  %v4378_v42 = vor.u32 %v5303_v30, %v4375_v31 }
  0x9f   :  { %2678 = vmatpush.bf16.msra.mxu3 %v4410_v6  ;;  %2621 = vmatmul.bf16.vlgmr.msrb.gmra.mxu2 %v5694_v8  ;;  %v4103_v43 = vld [vmem:[#allocation5 + $0x590] sm:$0xf0]  ;;  %v5267_v44 = vld [vmem:[#allocation5 + $0x684] sm:$0xf]  ;;  %v3978_v48 = vor.u32 %v5203_v36, %v3975_v39 }
  0xa0   :  { %v4231_v45 = vld [vmem:[#allocation5 + $0x690] sm:$0xf0]  ;;  %v5299_v46 = vld [vmem:[#allocation5 + $0x784] sm:$0xf]  ;;  %v4106_v49 = vor.u32 %v5235_v41, %v4103_v43 }
  0xa1   :  { %2640 = vmatpush.bf16.msra.mxu0 %v4010_v14  ;;  %2653 = vmatpush.bf16.msra.mxu1 %v4138_v16  ;;  %v4359_v47 = vld [vmem:[#allocation5 + $0x790] sm:$0xf0]  ;;  %v4234_v50 = vor.u32 %v5267_v44, %v4231_v45  ;;  %v5199_v51 = vld [vmem:[#allocation5 + $0x464] sm:$0xf] }
  0xa2   :  { %2666 = vmatpush.bf16.msra.mxu2 %v4266_v17  ;;  %v3959_v52 = vld [vmem:[#allocation5 + $0x470] sm:$0xf0]  ;;  %v5231_v53 = vld [vmem:[#allocation5 + $0x564] sm:$0xf]  ;;  %v4362_v54 = vor.u32 %v5299_v46, %v4359_v47 }
  0xa3   :  { %2679 = vmatpush.bf16.msra.mxu3 %v4394_v24  ;;  %v4087_v55 = vld [vmem:[#allocation5 + $0x570] sm:$0xf0]  ;;  %v5263_v56 = vld [vmem:[#allocation5 + $0x664] sm:$0xf]  ;;  %v3962_v60 = vor.u32 %v5199_v51, %v3959_v52 }
  0xa4   :  { %v4215_v57 = vld [vmem:[#allocation5 + $0x670] sm:$0xf0]  ;;  %v5295_v58 = vld [vmem:[#allocation5 + $0x764] sm:$0xf]  ;;  %v4090_v61 = vor.u32 %v5231_v53, %v4087_v55 }
  0xa5   :  { %2641 = vmatpush.bf16.msra.mxu0 %v3994_v32  ;;  %2654 = vmatpush.bf16.msra.mxu1 %v4122_v33  ;;  %v4343_v59 = vld [vmem:[#allocation5 + $0x770] sm:$0xf0]  ;;  %v4218_v62 = vor.u32 %v5263_v56, %v4215_v57  ;;  %v5195_v63 = vld [vmem:[#allocation5 + $0x444] sm:$0xf] }
  0xa6   :  { %2667 = vmatpush.bf16.msra.mxu2 %v4250_v35  ;;  %v3943_v0 = vld [vmem:[#allocation5 + $0x450] sm:$0xf0]  ;;  %v5227_v1 = vld [vmem:[#allocation5 + $0x544] sm:$0xf]  ;;  %v4346_v2 = vor.u32 %v5295_v58, %v4343_v59 }
  0xa7   :  { %2680 = vmatpush.bf16.msra.mxu3 %v4378_v42  ;;  %v4071_v3 = vld [vmem:[#allocation5 + $0x550] sm:$0xf0]  ;;  %v5259_v4 = vld [vmem:[#allocation5 + $0x644] sm:$0xf]  ;;  %v3946_v10 = vor.u32 %v5195_v63, %v3943_v0 }
  0xa8   :  { %v4199_v5 = vld [vmem:[#allocation5 + $0x650] sm:$0xf0]  ;;  %v5291_v6 = vld [vmem:[#allocation5 + $0x744] sm:$0xf]  ;;  %v4074_v11 = vor.u32 %v5227_v1, %v4071_v3 }
  0xa9   :  { %2642 = vmatpush.bf16.msra.mxu0 %v3978_v48  ;;  %2655 = vmatpush.bf16.msra.mxu1 %v4106_v49  ;;  %v4327_v7 = vld [vmem:[#allocation5 + $0x750] sm:$0xf0]  ;;  %v4202_v12 = vor.u32 %v5259_v4, %v4199_v5  ;;  %v5191_v13 = vld [vmem:[#allocation5 + $0x424] sm:$0xf] }
  0xaa   :  { %2668 = vmatpush.bf16.msra.mxu2 %v4234_v50  ;;  %v3927_v14 = vld [vmem:[#allocation5 + $0x430] sm:$0xf0]  ;;  %v5223_v16 = vld [vmem:[#allocation5 + $0x524] sm:$0xf]  ;;  %v4330_v17 = vor.u32 %v5291_v6, %v4327_v7 }
  0xab   :  { %2681 = vmatpush.bf16.msra.mxu3 %v4362_v54  ;;  %v4055_v19 = vld [vmem:[#allocation5 + $0x530] sm:$0xf0]  ;;  %v5255_v20 = vld [vmem:[#allocation5 + $0x624] sm:$0xf]  ;;  %v3930_v28 = vor.u32 %v5191_v13, %v3927_v14 }
  0xac   :  { %v4183_v21 = vld [vmem:[#allocation5 + $0x630] sm:$0xf0]  ;;  %v5287_v24 = vld [vmem:[#allocation5 + $0x724] sm:$0xf]  ;;  %v4058_v31 = vor.u32 %v5223_v16, %v4055_v19 }
  0xad   :  { %2643 = vmatpush.bf16.msra.mxu0 %v3962_v60  ;;  %2656 = vmatpush.bf16.msra.mxu1 %v4090_v61  ;;  %v4311_v26 = vld [vmem:[#allocation5 + $0x730] sm:$0xf0]  ;;  %v5187_v29 = vld [vmem:[#allocation5 + $0x404] sm:$0xf]  ;;  %v4186_v32 = vor.u32 %v5255_v20, %v4183_v21 }
  0xae   :  { %2669 = vmatpush.bf16.msra.mxu2 %v4218_v62  ;;  %v3911_v30 = vld [vmem:[#allocation5 + $0x410] sm:$0xf0]  ;;  %v5219_v33 = vld [vmem:[#allocation5 + $0x504] sm:$0xf]  ;;  %v4314_v39 = vor.u32 %v5287_v24, %v4311_v26 }
  0xaf   :  { %2682 = vmatpush.bf16.msra.mxu3 %v4346_v2  ;;  %v4039_v35 = vld [vmem:[#allocation5 + $0x510] sm:$0xf0]  ;;  %v5251_v36 = vld [vmem:[#allocation5 + $0x604] sm:$0xf]  ;;  %v3914_v47 = vor.u32 %v5187_v29, %v3911_v30 }
  0xb0   :  { %v4167_v41 = vld [vmem:[#allocation5 + $0x610] sm:$0xf0]  ;;  %v5283_v42 = vld [vmem:[#allocation5 + $0x704] sm:$0xf]  ;;  %v4042_v51 = vor.u32 %v5219_v33, %v4039_v35  ;;  %v5738_v35 = vld [vmem:[#allocation7] sm:$0xf] }
  0xb1   :  { %2644 = vmatpush.bf16.msra.mxu0 %v3946_v10  ;;  %2657 = vmatpush.bf16.msra.mxu1 %v4074_v11  ;;  %v4295_v43 = vld [vmem:[#allocation5 + $0x710] sm:$0xf0]  ;;  %v5343_v44 = vld [vmem:[#allocation5 + $0x8e4] sm:$0xf]  ;;  %v4170_v52 = vor.u32 %v5251_v36, %v4167_v41 }
  0xb2   :  { %2670 = vmatpush.bf16.msra.mxu2 %v4202_v12  ;;  %v4535_v45 = vld [vmem:[#allocation5 + $0x8f0] sm:$0xf0]  ;;  %v5375_v46 = vld [vmem:[#allocation5 + $0x9e4] sm:$0xf]  ;;  %v4298_v55 = vor.u32 %v5283_v42, %v4295_v43 }
  0xb3   :  { %2683 = vmatpush.bf16.msra.mxu3 %v4330_v17  ;;  %v4663_v48 = vld [vmem:[#allocation5 + $0x9f0] sm:$0xf0]  ;;  %v5407_v49 = vld [vmem:[#allocation5 + $0xae4] sm:$0xf]  ;;  %v4538_v56 = vor.u32 %v5343_v44, %v4535_v45 }
  0xb4   :  { %v4791_v50 = vld [vmem:[#allocation5 + $0xaf0] sm:$0xf0]  ;;  %v5439_v53 = vld [vmem:[#allocation5 + $0xbe4] sm:$0xf]  ;;  %v4666_v57 = vor.u32 %v5375_v46, %v4663_v48 }
  0xb5   :  { %2645 = vmatpush.bf16.msra.mxu0 %v3930_v28  ;;  %2658 = vmatpush.bf16.msra.mxu1 %v4058_v31  ;;  %v4919_v54 = vld [vmem:[#allocation5 + $0xbf0] sm:$0xf0]  ;;  %v4794_v58 = vor.u32 %v5407_v49, %v4791_v50  ;;  %v5339_v59 = vld [vmem:[#allocation5 + $0x8c4] sm:$0xf] }
  0xb6   :  { %2671 = vmatpush.bf16.msra.mxu2 %v4186_v32  ;;  %v4519_v60 = vld [vmem:[#allocation5 + $0x8d0] sm:$0xf0]  ;;  %v5371_v61 = vld [vmem:[#allocation5 + $0x9c4] sm:$0xf]  ;;  %v4922_v62 = vor.u32 %v5439_v53, %v4919_v54 }
  0xb7   :  { %2684 = vmatpush.bf16.msra.mxu3 %v4314_v39  ;;  %v4647_v63 = vld [vmem:[#allocation5 + $0x9d0] sm:$0xf0]  ;;  %v5403_v0 = vld [vmem:[#allocation5 + $0xac4] sm:$0xf]  ;;  %v4522_v4 = vor.u32 %v5339_v59, %v4519_v60 }
  0xb8   :  { %v4775_v1 = vld [vmem:[#allocation5 + $0xad0] sm:$0xf0]  ;;  %v5435_v2 = vld [vmem:[#allocation5 + $0xbc4] sm:$0xf]  ;;  %v4650_v5 = vor.u32 %v5371_v61, %v4647_v63 }
  0xb9   :  { %2646 = vmatpush.bf16.msra.mxu0 %v3914_v47  ;;  %2659 = vmatpush.bf16.msra.mxu1 %v4042_v51  ;;  %v4903_v3 = vld [vmem:[#allocation5 + $0xbd0] sm:$0xf0]  ;;  %v4778_v6 = vor.u32 %v5403_v0, %v4775_v1  ;;  %v5335_v7 = vld [vmem:[#allocation5 + $0x8a4] sm:$0xf]  ;;  %v503_v47 = vperm.slane %v5738_v35, 0 }
  0xba   :  { %2672 = vmatpush.bf16.msra.mxu2 %v4170_v52  ;;  %v4503_v10 = vld [vmem:[#allocation5 + $0x8b0] sm:$0xf0]  ;;  %v5367_v11 = vld [vmem:[#allocation5 + $0x9a4] sm:$0xf]  ;;  %v4906_v12 = vor.u32 %v5435_v2, %v4903_v3 }
  0xbb   :  { %2685 = vmatpush.bf16.msra.mxu3 %v4298_v55  ;;  %v4631_v13 = vld [vmem:[#allocation5 + $0x9b0] sm:$0xf0]  ;;  %v5399_v14 = vld [vmem:[#allocation5 + $0xaa4] sm:$0xf]  ;;  %v4506_v20 = vor.u32 %v5335_v7, %v4503_v10 }
  0xbc   :  { %v4759_v16 = vld [vmem:[#allocation5 + $0xab0] sm:$0xf0]  ;;  %v5431_v17 = vld [vmem:[#allocation5 + $0xba4] sm:$0xf]  ;;  %2647 = vmatmul.bf16.vlgmr.msra.gmra.mxu0 %v5708_v37  ;;  %2660 = vmatmul.bf16.vlgmr.msra.gmra.mxu1 %v5712_v40  ;;  %v4634_v24 = vor.u32 %v5367_v11, %v4631_v13 }
  0xbd   :  { %2691 = vmatpush.bf16.msrb.mxu0 %v4538_v56  ;;  %2704 = vmatpush.bf16.msrb.mxu1 %v4666_v57  ;;  %v4887_v19 = vld [vmem:[#allocation5 + $0xbb0] sm:$0xf0]  ;;  %v5331_v21 = vld [vmem:[#allocation5 + $0x884] sm:$0xf]  ;;  %v4762_v26 = vor.u32 %v5399_v14, %v4759_v16 }
  0xbe   :  { %2717 = vmatpush.bf16.msrb.mxu2 %v4794_v58  ;;  %2686 = vmatmul.bf16.vlgmr.msra.gmra.mxu3 %v5710_v38  ;;  %v4487_v28 = vld [vmem:[#allocation5 + $0x890] sm:$0xf0]  ;;  %v5363_v29 = vld [vmem:[#allocation5 + $0x984] sm:$0xf]  ;;  %v4890_v31 = vor.u32 %v5431_v17, %v4887_v19 }
  0xbf   :  { %2730 = vmatpush.bf16.msrb.mxu3 %v4922_v62  ;;  %2673 = vmatmul.bf16.vlgmr.msra.gmra.mxu2 %v5706_v34  ;;  %v4615_v30 = vld [vmem:[#allocation5 + $0x990] sm:$0xf0]  ;;  %v5395_v32 = vld [vmem:[#allocation5 + $0xa84] sm:$0xf]  ;;  %v4490_v41 = vor.u32 %v5331_v21, %v4487_v28  ;;  %v2479_v28 = vpop.f32.mrf.mxu3 }
  0xc0   :  { %v4743_v33 = vld [vmem:[#allocation5 + $0xa90] sm:$0xf0]  ;;  %v5427_v36 = vld [vmem:[#allocation5 + $0xb84] sm:$0xf]  ;;  %v4618_v43 = vor.u32 %v5363_v29, %v4615_v30 }
  0xc1   :  { %2692 = vmatpush.bf16.msrb.mxu0 %v4522_v4  ;;  %2705 = vmatpush.bf16.msrb.mxu1 %v4650_v5  ;;  %v4871_v39 = vld [vmem:[#allocation5 + $0xb90] sm:$0xf0]  ;;  %v5327_v42 = vld [vmem:[#allocation5 + $0x864] sm:$0xf]  ;;  %v4746_v44 = vor.u32 %v5395_v32, %v4743_v33  ;;  %v2453_v5 = vpop.f32.mrf.mxu1 }
  0xc2   :  { %2718 = vmatpush.bf16.msrb.mxu2 %v4778_v6  ;;  %v4471_v45 = vld [vmem:[#allocation5 + $0x870] sm:$0xf0]  ;;  %v5359_v46 = vld [vmem:[#allocation5 + $0x964] sm:$0xf]  ;;  %v4874_v48 = vor.u32 %v5427_v36, %v4871_v39 }
  0xc3   :  { %2731 = vmatpush.bf16.msrb.mxu3 %v4906_v12  ;;  %v4599_v49 = vld [vmem:[#allocation5 + $0x970] sm:$0xf0]  ;;  %v5391_v50 = vld [vmem:[#allocation5 + $0xa64] sm:$0xf]  ;;  %v4474_v54 = vor.u32 %v5327_v42, %v4471_v45 }
  0xc4   :  { %v4727_v51 = vld [vmem:[#allocation5 + $0xa70] sm:$0xf0]  ;;  %v5423_v52 = vld [vmem:[#allocation5 + $0xb64] sm:$0xf]  ;;  %v2440_v55 = vpop.f32.mrf.mxu0  ;;  %v4602_v56 = vor.u32 %v5359_v46, %v4599_v49  ;;  %v5090_v49 = vld [vmem:[#allocation5 + $0xf4] sm:$0xf0] }
  0xc5   :  { %2693 = vmatpush.bf16.msrb.mxu0 %v4506_v20  ;;  %2706 = vmatpush.bf16.msrb.mxu1 %v4634_v24  ;;  %v4855_v53 = vld [vmem:[#allocation5 + $0xb70] sm:$0xf0]  ;;  %v4730_v57 = vor.u32 %v5391_v50, %v4727_v51  ;;  %v5323_v58 = vld [vmem:[#allocation5 + $0x844] sm:$0xf]  ;;  %v2441_v61 = vadd.f32 %v2440_v55, %v503_v47  ;;  %v3645_v50 = vld [vmem:[#allocation5 + $0x1e8] sm:$0xf] }
  0xc6   :  { %2719 = vmatpush.bf16.msrb.mxu2 %v4762_v26  ;;  %v4455_v59 = vld [vmem:[#allocation5 + $0x850] sm:$0xf0]  ;;  %v5355_v60 = vld [vmem:[#allocation5 + $0x944] sm:$0xf]  ;;  %v4858_v62 = vor.u32 %v5423_v52, %v4855_v53  ;;  %v5122_v52 = vld [vmem:[#allocation5 + $0x1f4] sm:$0xf0] }
  0xc7   :  { %2732 = vmatpush.bf16.msrb.mxu3 %v4890_v31  ;;  %v4583_v63 = vld [vmem:[#allocation5 + $0x950] sm:$0xf0]  ;;  %v5387_v0 = vld [vmem:[#allocation5 + $0xa44] sm:$0xf]  ;;  %v4458_v4 = vor.u32 %v5323_v58, %v4455_v59  ;;  %v2454_v13 = vadd.f32 %v2453_v5, %v2441_v61  ;;  %v3773_v53 = vld [vmem:[#allocation5 + $0x2e8] sm:$0xf] }
  0xc8   :  { %v4711_v1 = vld [vmem:[#allocation5 + $0xa50] sm:$0xf0]  ;;  %v5419_v2 = vld [vmem:[#allocation5 + $0xb44] sm:$0xf]  ;;  %v4586_v6 = vor.u32 %v5355_v60, %v4583_v63  ;;  %v3901_v58 = vld [vmem:[#allocation5 + $0x3e8] sm:$0xf]  ;;  %v3646_v63 = vor.u32 %v5122_v52, %v3645_v50 }
  0xc9   :  { %2694 = vmatpush.bf16.msrb.mxu0 %v4490_v41  ;;  %2707 = vmatpush.bf16.msrb.mxu1 %v4618_v43  ;;  %v4839_v3 = vld [vmem:[#allocation5 + $0xb50] sm:$0xf0]  ;;  %v4714_v7 = vor.u32 %v5387_v0, %v4711_v1  ;;  %v5319_v10 = vld [vmem:[#allocation5 + $0x824] sm:$0xf]  ;;  %v2466_v20 = vpop.f32.mrf.mxu2  ;;  %v2455_v55 = vpop.f32.mrf.mxu1  ;;  %v5186_v59 = vld [vmem:[#allocation5 + $0x3f4] sm:$0xf0] }
  0xca   :  { %2720 = vmatpush.bf16.msrb.mxu2 %v4746_v44  ;;  %v4439_v11 = vld [vmem:[#allocation5 + $0x830] sm:$0xf0]  ;;  %v5351_v12 = vld [vmem:[#allocation5 + $0x924] sm:$0xf]  ;;  %v4842_v14 = vor.u32 %v5419_v2, %v4839_v3  ;;  %v2467_v26 = vadd.f32 %v2466_v20, %v2454_v13  ;;  %v3501_v1 = vld [vmem:[#allocation5 + $0xc8] sm:$0xf]  ;;  %v3902_v5 = vor.u32 %v5186_v59, %v3901_v58 }
  0xcb   :  { %2733 = vmatpush.bf16.msrb.mxu3 %v4874_v48  ;;  %v4567_v16 = vld [vmem:[#allocation5 + $0x930] sm:$0xf0]  ;;  %v5383_v17 = vld [vmem:[#allocation5 + $0xa24] sm:$0xf]  ;;  %v4442_v29 = vor.u32 %v5319_v10, %v4439_v11  ;;  %v3517_v48 = vld [vmem:[#allocation5 + $0xe8] sm:$0xf] }
  0xcc   :  { %v4695_v19 = vld [vmem:[#allocation5 + $0xa30] sm:$0xf0]  ;;  %v5415_v21 = vld [vmem:[#allocation5 + $0xb24] sm:$0xf]  ;;  %v2442_v32 = vpop.f32.mrf.mxu0  ;;  %v4570_v33 = vor.u32 %v5351_v12, %v4567_v16  ;;  %v5741_v43 = vadd.f32 %v2479_v28, %v2467_v26  ;;  %v3518_v61 = vor.u32 %v5090_v49, %v3517_v48  ;;  %v5086_v2 = vld [vmem:[#allocation5 + $0xd4] sm:$0xf0] }
  0xcd   :  { %2695 = vmatpush.bf16.msrb.mxu0 %v4474_v54  ;;  %2708 = vmatpush.bf16.msrb.mxu1 %v4602_v56  ;;  %v4823_v24 = vld [vmem:[#allocation5 + $0xb30] sm:$0xf0]  ;;  %v5315_v30 = vld [vmem:[#allocation5 + $0x804] sm:$0xf]  ;;  %v4698_v36 = vor.u32 %v5383_v17, %v4695_v19  ;;  %v5154_v54 = vld [vmem:[#allocation5 + $0x2f4] sm:$0xf0]  ;;  %v3502_v13 = vor.u32 %v5086_v2, %v3501_v1 }
  0xce   :  { %2721 = vmatpush.bf16.msrb.mxu2 %v4730_v57  ;;  %v4423_v31 = vld [vmem:[#allocation5 + $0x810] sm:$0xf0]  ;;  %v5347_v39 = vld [vmem:[#allocation5 + $0x904] sm:$0xf]  ;;  %v4826_v44 = vor.u32 %v5415_v21, %v4823_v24  ;;  %v3774_v0 = vor.u32 %v5154_v54, %v3773_v53  ;;  %v3629_v3 = vld [vmem:[#allocation5 + $0x1c8] sm:$0xf] }
  0xcf   :  { %2734 = vmatpush.bf16.msrb.mxu3 %v4858_v62  ;;  %v4551_v41 = vld [vmem:[#allocation5 + $0x910] sm:$0xf0]  ;;  %v5379_v42 = vld [vmem:[#allocation5 + $0xa04] sm:$0xf]  ;;  %v4426_v51 = vor.u32 %v5315_v30, %v4423_v31  ;;  %v5150_v10 = vld [vmem:[#allocation5 + $0x2d4] sm:$0xf0] }
  0xd0   :  { %v4679_v45 = vld [vmem:[#allocation5 + $0xa10] sm:$0xf0]  ;;  %v5411_v46 = vld [vmem:[#allocation5 + $0xb04] sm:$0xf]  ;;  %v4554_v56 = vor.u32 %v5347_v39, %v4551_v41  ;;  %v3885_v11 = vld [vmem:[#allocation5 + $0x3c8] sm:$0xf] }
  0xd1   :  { %2696 = vmatpush.bf16.msrb.mxu0 %v4458_v4  ;;  %2709 = vmatpush.bf16.msrb.mxu1 %v4586_v6  ;;  %v4807_v47 = vld [vmem:[#allocation5 + $0xb10] sm:$0xf0]  ;;  %v4682_v57 = vor.u32 %v5379_v42, %v4679_v45  ;;  %v2468_v62 = vpop.f32.mrf.mxu2  ;;  %v2481_v4 = vpop.f32.mrf.mxu3  ;;  %v5118_v6 = vld [vmem:[#allocation5 + $0x1d4] sm:$0xf0]  ;;  %v3485_v17 = vld [vmem:[#allocation5 + $0xa8] sm:$0xf] }
  0xd2   :  { %2722 = vmatpush.bf16.msrb.mxu2 %v4714_v7  ;;  %v4810_v60 = vor.u32 %v5411_v46, %v4807_v47  ;;  %v3757_v7 = vld [vmem:[#allocation5 + $0x2c8] sm:$0xf]  ;;  %v5182_v12 = vld [vmem:[#allocation5 + $0x3d4] sm:$0xf0] }
  0xd3   :  { %2735 = vmatpush.bf16.msrb.mxu3 %v4842_v14  ;;  %v3630_v14 = vor.u32 %v5118_v6, %v3629_v3  ;;  %v3758_v16 = vor.u32 %v5150_v10, %v3757_v7  ;;  %v5082_v19 = vld [vmem:[#allocation5 + $0xb4] sm:$0xf0]  ;;  %v3613_v20 = vld [vmem:[#allocation5 + $0x1a8] sm:$0xf]  ;;  %v3886_v21 = vor.u32 %v5182_v12, %v3885_v11 }
  0xd4   :  { %v5114_v24 = vld [vmem:[#allocation5 + $0x1b4] sm:$0xf0]  ;;  %v3741_v26 = vld [vmem:[#allocation5 + $0x2a8] sm:$0xf]  ;;  %v3486_v31 = vor.u32 %v5082_v19, %v3485_v17 }
  0xd5   :  { %2697 = vmatpush.bf16.msrb.mxu0 %v4442_v29  ;;  %2710 = vmatpush.bf16.msrb.mxu1 %v4570_v33  ;;  %v5146_v28 = vld [vmem:[#allocation5 + $0x2b4] sm:$0xf0]  ;;  %v3869_v29 = vld [vmem:[#allocation5 + $0x3a8] sm:$0xf]  ;;  %v3614_v32 = vor.u32 %v5114_v24, %v3613_v20 }
  0xd6   :  { %2723 = vmatpush.bf16.msrb.mxu2 %v4698_v36  ;;  %v5178_v30 = vld [vmem:[#allocation5 + $0x3b4] sm:$0xf0]  ;;  %v3742_v33 = vor.u32 %v5146_v28, %v3741_v26  ;;  %v3469_v36 = vld [vmem:[#allocation5 + $0x88] sm:$0xf] }
  0xd7   :  { %2736 = vmatpush.bf16.msrb.mxu3 %v4826_v44  ;;  %v5078_v39 = vld [vmem:[#allocation5 + $0x94] sm:$0xf0]  ;;  %v3597_v41 = vld [vmem:[#allocation5 + $0x188] sm:$0xf]  ;;  %v3870_v42 = vor.u32 %v5178_v30, %v3869_v29 }
  0xd8   :  { %v5110_v44 = vld [vmem:[#allocation5 + $0x194] sm:$0xf0]  ;;  %v3725_v45 = vld [vmem:[#allocation5 + $0x288] sm:$0xf]  ;;  %v3470_v49 = vor.u32 %v5078_v39, %v3469_v36 }
  0xd9   :  { %2698 = vmatpush.bf16.msrb.mxu0 %v4426_v51  ;;  %2711 = vmatpush.bf16.msrb.mxu1 %v4554_v56  ;;  %v5142_v46 = vld [vmem:[#allocation5 + $0x294] sm:$0xf0]  ;;  %v3853_v47 = vld [vmem:[#allocation5 + $0x388] sm:$0xf]  ;;  %v3598_v51 = vor.u32 %v5110_v44, %v3597_v41 }
  0xda   :  { %2724 = vmatpush.bf16.msrb.mxu2 %v4682_v57  ;;  %v5174_v48 = vld [vmem:[#allocation5 + $0x394] sm:$0xf0]  ;;  %v3726_v52 = vor.u32 %v5142_v46, %v3725_v45  ;;  %v3453_v53 = vld [vmem:[#allocation5 + $0x68] sm:$0xf]  ;;  %v2505_v57 = vpop.f32.mrf.mxu1 }
  0xdb   :  { %2737 = vmatpush.bf16.msrb.mxu3 %v4810_v60  ;;  %v5074_v54 = vld [vmem:[#allocation5 + $0x74] sm:$0xf0]  ;;  %v3581_v55 = vld [vmem:[#allocation5 + $0x168] sm:$0xf]  ;;  %v3854_v58 = vor.u32 %v5174_v48, %v3853_v47 }
  0xdc   :  { %2699 = vmatmul.bf16.vlgmr.msrb.gmra.mxu0 %v5718_v18  ;;  %2712 = vmatmul.bf16.vlgmr.msrb.gmra.mxu1 %v5722_v23  ;;  %v5106_v59 = vld [vmem:[#allocation5 + $0x174] sm:$0xf0]  ;;  %v3709_v60 = vld [vmem:[#allocation5 + $0x268] sm:$0xf]  ;;  %v3454_v1 = vor.u32 %v5074_v54, %v3453_v53 }
  0xdd   :  { %2743 = vmatpush.bf16.msra.mxu0 %v3518_v61  ;;  %2756 = vmatpush.bf16.msra.mxu1 %v3646_v63  ;;  %v2492_v50 = vpop.f32.mrf.mxu0  ;;  %v5138_v61 = vld [vmem:[#allocation5 + $0x274] sm:$0xf0]  ;;  %v3837_v62 = vld [vmem:[#allocation5 + $0x368] sm:$0xf]  ;;  %v3582_v2 = vor.u32 %v5106_v59, %v3581_v55 }
  0xde   :  { %2769 = vmatpush.bf16.msra.mxu2 %v3774_v0  ;;  %2738 = vmatmul.bf16.vlgmr.msrb.gmra.mxu3 %v5724_v27  ;;  %v2493_v56 = vadd.f32 %v2492_v50, %v5741_v43  ;;  %v5170_v63 = vld [vmem:[#allocation5 + $0x374] sm:$0xf0]  ;;  %v3710_v3 = vor.u32 %v5138_v61, %v3709_v60  ;;  %v3437_v4 = vld [vmem:[#allocation5 + $0x48] sm:$0xf] }
  0xdf   :  { %2782 = vmatpush.bf16.msra.mxu3 %v3902_v5  ;;  %2725 = vmatmul.bf16.vlgmr.msrb.gmra.mxu2 %v5720_v22  ;;  %v5070_v5 = vld [vmem:[#allocation5 + $0x54] sm:$0xf0]  ;;  %v3565_v6 = vld [vmem:[#allocation5 + $0x148] sm:$0xf]  ;;  %v3838_v43 = vor.u32 %v5170_v63, %v3837_v62 }
  0xe0   :  { %v2506_v0 = vadd.f32 %v2505_v57, %v2493_v56  ;;  %v5102_v10 = vld [vmem:[#allocation5 + $0x154] sm:$0xf0]  ;;  %v3693_v11 = vld [vmem:[#allocation5 + $0x248] sm:$0xf]  ;;  %v3438_v19 = vor.u32 %v5070_v5, %v3437_v4 }
  0xe1   :  { %2744 = vmatpush.bf16.msra.mxu0 %v3502_v13  ;;  %2757 = vmatpush.bf16.msra.mxu1 %v3630_v14  ;;  %v5134_v12 = vld [vmem:[#allocation5 + $0x254] sm:$0xf0]  ;;  %v2531_v14 = vpop.f32.mrf.mxu3  ;;  %v3566_v24 = vor.u32 %v5102_v10, %v3565_v6  ;;  %v3421_v28 = vld [vmem:[#allocation5 + $0x28] sm:$0xf] }
  0xe2   :  { %2770 = vmatpush.bf16.msra.mxu2 %v3758_v16  ;;  %v2518_v7 = vpop.f32.mrf.mxu2  ;;  %v3821_v16 = vld [vmem:[#allocation5 + $0x348] sm:$0xf]  ;;  %v5166_v17 = vld [vmem:[#allocation5 + $0x354] sm:$0xf0]  ;;  %v3694_v26 = vor.u32 %v5134_v12, %v3693_v11 }
  0xe3   :  { %2783 = vmatpush.bf16.msra.mxu3 %v3886_v21  ;;  %v2519_v13 = vadd.f32 %v2518_v7, %v2506_v0  ;;  %v5066_v29 = vld [vmem:[#allocation5 + $0x34] sm:$0xf0]  ;;  %v3549_v30 = vld [vmem:[#allocation5 + $0x128] sm:$0xf] }
  0xe4   :  { %v3677_v36 = vld [vmem:[#allocation5 + $0x228] sm:$0xf]  ;;  %v5130_v39 = vld [vmem:[#allocation5 + $0x234] sm:$0xf0]  ;;  %v3422_v44 = vor.u32 %v5066_v29, %v3421_v28 }
  0xe5   :  { %2745 = vmatpush.bf16.msra.mxu0 %v3486_v31  ;;  %2758 = vmatpush.bf16.msra.mxu1 %v3614_v32  ;;  %v5748_v20 = vadd.f32 %v2531_v14, %v2519_v13  ;;  %v2494_v21 = vpop.f32.mrf.mxu0  ;;  %v2507_v31 = vpop.f32.mrf.mxu1  ;;  %v3822_v32 = vor.u32 %v5166_v17, %v3821_v16  ;;  %v3805_v41 = vld [vmem:[#allocation5 + $0x328] sm:$0xf]  ;;  %v5062_v46 = vld [vmem:[#allocation5 + $0x14] sm:$0xf0]  ;;  %v3678_v48 = vor.u32 %v5130_v39, %v3677_v36 }
  0xe6   :  { %2771 = vmatpush.bf16.msra.mxu2 %v3742_v33  ;;  %v5098_v33 = vld [vmem:[#allocation5 + $0x134] sm:$0xf0]  ;;  %v3405_v45 = vld [vmem:[#allocation5 + $0x8] sm:$0xf] }
  0xe7   :  { %2784 = vmatpush.bf16.msra.mxu3 %v3870_v42  ;;  %v5162_v42 = vld [vmem:[#allocation5 + $0x334] sm:$0xf0]  ;;  %v3550_v47 = vor.u32 %v5098_v33, %v3549_v30  ;;  %v3789_v55 = vld [vmem:[#allocation5 + $0x308] sm:$0xf]  ;;  %v3406_v61 = vor.u32 %v5062_v46, %v3405_v45 }
  0xe8   :  { %v5094_v50 = vld [vmem:[#allocation5 + $0x114] sm:$0xf0]  ;;  %v3806_v53 = vor.u32 %v5162_v42, %v3805_v41  ;;  %v4157_v60 = vld [vmem:[#allocation5 + $0x5e8] sm:$0xf] }
  0xe9   :  { %2746 = vmatpush.bf16.msra.mxu0 %v3470_v49  ;;  %2759 = vmatpush.bf16.msra.mxu1 %v3598_v51  ;;  %v3533_v49 = vld [vmem:[#allocation5 + $0x108] sm:$0xf]  ;;  %v5126_v54 = vld [vmem:[#allocation5 + $0x214] sm:$0xf0]  ;;  %v2533_v57 = vpop.f32.mrf.mxu3 }
  0xea   :  { %2772 = vmatpush.bf16.msra.mxu2 %v3726_v52  ;;  %v3661_v51 = vld [vmem:[#allocation5 + $0x208] sm:$0xf]  ;;  %v2520_v52 = vpop.f32.mrf.mxu2  ;;  %v5158_v56 = vld [vmem:[#allocation5 + $0x314] sm:$0xf0] }
  0xeb   :  { %2785 = vmatpush.bf16.msra.mxu3 %v3854_v58  ;;  %v4029_v58 = vld [vmem:[#allocation5 + $0x4e8] sm:$0xf]  ;;  %v5218_v59 = vld [vmem:[#allocation5 + $0x4f4] sm:$0xf0]  ;;  %v3790_v5 = vor.u32 %v5158_v56, %v3789_v55 }
  0xec   :  { %v5250_v62 = vld [vmem:[#allocation5 + $0x5f4] sm:$0xf0]  ;;  %v4285_v63 = vld [vmem:[#allocation5 + $0x6e8] sm:$0xf]  ;;  %v4030_v6 = vor.u32 %v5218_v59, %v4029_v58 }
  0xed   :  { %2747 = vmatpush.bf16.msra.mxu0 %v3454_v1  ;;  %2760 = vmatpush.bf16.msra.mxu1 %v3582_v2  ;;  %v5282_v0 = vld [vmem:[#allocation5 + $0x6f4] sm:$0xf0]  ;;  %v3534_v1 = vor.u32 %v5094_v50, %v3533_v49  ;;  %v3662_v2 = vor.u32 %v5126_v54, %v3661_v51  ;;  %v4158_v7 = vor.u32 %v5250_v62, %v4157_v60  ;;  %v4013_v10 = vld [vmem:[#allocation5 + $0x4c8] sm:$0xf] }
  0xee   :  { %2773 = vmatpush.bf16.msra.mxu2 %v3710_v3  ;;  %v4413_v3 = vld [vmem:[#allocation5 + $0x7e8] sm:$0xf]  ;;  %v5314_v4 = vld [vmem:[#allocation5 + $0x7f4] sm:$0xf0] }
  0xef   :  { %2786 = vmatpush.bf16.msra.mxu3 %v3838_v43  ;;  %v4286_v43 = vor.u32 %v5282_v0, %v4285_v63  ;;  %v5214_v11 = vld [vmem:[#allocation5 + $0x4d4] sm:$0xf0]  ;;  %v4141_v12 = vld [vmem:[#allocation5 + $0x5c8] sm:$0xf]  ;;  %v4414_v13 = vor.u32 %v5314_v4, %v4413_v3 }
  0xf0   :  { %v5246_v14 = vld [vmem:[#allocation5 + $0x5d4] sm:$0xf0]  ;;  %v4269_v16 = vld [vmem:[#allocation5 + $0x6c8] sm:$0xf] }
  0xf1   :  { %2748 = vmatpush.bf16.msra.mxu0 %v3438_v19  ;;  %2761 = vmatpush.bf16.msra.mxu1 %v3566_v24  ;;  %v5278_v17 = vld [vmem:[#allocation5 + $0x6d4] sm:$0xf0]  ;;  %v4397_v19 = vld [vmem:[#allocation5 + $0x7c8] sm:$0xf]  ;;  %v4014_v24 = vor.u32 %v5214_v11, %v4013_v10 }
  0xf2   :  { %2774 = vmatpush.bf16.msra.mxu2 %v3694_v26  ;;  %v5310_v21 = vld [vmem:[#allocation5 + $0x7d4] sm:$0xf0]  ;;  %v4142_v26 = vor.u32 %v5246_v14, %v4141_v12  ;;  %v4270_v28 = vor.u32 %v5278_v17, %v4269_v16  ;;  %v3997_v29 = vld [vmem:[#allocation5 + $0x4a8] sm:$0xf] }
  0xf3   :  { %2787 = vmatpush.bf16.msra.mxu3 %v3822_v32  ;;  %v5210_v30 = vld [vmem:[#allocation5 + $0x4b4] sm:$0xf0]  ;;  %v4125_v31 = vld [vmem:[#allocation5 + $0x5a8] sm:$0xf]  ;;  %v4398_v32 = vor.u32 %v5310_v21, %v4397_v19 }
  0xf4   :  { %v5242_v33 = vld [vmem:[#allocation5 + $0x5b4] sm:$0xf0]  ;;  %v4253_v36 = vld [vmem:[#allocation5 + $0x6a8] sm:$0xf] }
  0xf5   :  { %2749 = vmatpush.bf16.msra.mxu0 %v3422_v44  ;;  %2762 = vmatpush.bf16.msra.mxu1 %v3550_v47  ;;  %v5274_v39 = vld [vmem:[#allocation5 + $0x6b4] sm:$0xf0]  ;;  %v4381_v41 = vld [vmem:[#allocation5 + $0x7a8] sm:$0xf]  ;;  %v3998_v44 = vor.u32 %v5210_v30, %v3997_v29  ;;  %v4126_v45 = vor.u32 %v5242_v33, %v4125_v31 }
  0xf6   :  { %2775 = vmatpush.bf16.msra.mxu2 %v3678_v48  ;;  %v5306_v42 = vld [vmem:[#allocation5 + $0x7b4] sm:$0xf0]  ;;  %v4254_v46 = vor.u32 %v5274_v39, %v4253_v36  ;;  %v3981_v47 = vld [vmem:[#allocation5 + $0x488] sm:$0xf] }
  0xf7   :  { %2788 = vmatpush.bf16.msra.mxu3 %v3806_v53  ;;  %v5206_v48 = vld [vmem:[#allocation5 + $0x494] sm:$0xf0]  ;;  %v4109_v49 = vld [vmem:[#allocation5 + $0x588] sm:$0xf]  ;;  %v4382_v50 = vor.u32 %v5306_v42, %v4381_v41 }
  0xf8   :  { %v5238_v51 = vld [vmem:[#allocation5 + $0x594] sm:$0xf0]  ;;  %v4237_v52 = vld [vmem:[#allocation5 + $0x688] sm:$0xf]  ;;  %v3982_v58 = vor.u32 %v5206_v48, %v3981_v47 }
  0xf9   :  { %2750 = vmatpush.bf16.msra.mxu0 %v3406_v61  ;;  %2763 = vmatpush.bf16.msra.mxu1 %v3534_v1  ;;  %v5270_v53 = vld [vmem:[#allocation5 + $0x694] sm:$0xf0]  ;;  %v2544_v54 = vpop.f32.mrf.mxu0  ;;  %v4365_v55 = vld [vmem:[#allocation5 + $0x788] sm:$0xf]  ;;  %v2557_v59 = vpop.f32.mrf.mxu1  ;;  %v4110_v60 = vor.u32 %v5238_v51, %v4109_v49 }
  0xfa   :  { %2776 = vmatpush.bf16.msra.mxu2 %v3662_v2  ;;  %v5302_v56 = vld [vmem:[#allocation5 + $0x794] sm:$0xf0]  ;;  %v2545_v57 = vadd.f32 %v2544_v54, %v5748_v20  ;;  %v4238_v61 = vor.u32 %v5270_v53, %v4237_v52  ;;  %v3965_v62 = vld [vmem:[#allocation5 + $0x468] sm:$0xf] }
  0xfb   :  { %2789 = vmatpush.bf16.msra.mxu3 %v3790_v5  ;;  %v5202_v63 = vld [vmem:[#allocation5 + $0x474] sm:$0xf0]  ;;  %v4093_v0 = vld [vmem:[#allocation5 + $0x568] sm:$0xf]  ;;  %v4366_v1 = vor.u32 %v5302_v56, %v4365_v55 }
  0xfc   :  { %2751 = vmatmul.bf16.vlgmr.msra.gmra.mxu0 %v5696_v9  ;;  %2764 = vmatmul.bf16.vlgmr.msra.gmra.mxu1 %v5703_v25  ;;  %v2558_v2 = vadd.f32 %v2557_v59, %v2545_v57  ;;  %v5234_v3 = vld [vmem:[#allocation5 + $0x574] sm:$0xf0]  ;;  %v4221_v4 = vld [vmem:[#allocation5 + $0x668] sm:$0xf] }
  0xfd   :  { %2795 = vmatpush.bf16.msrb.mxu0 %v4030_v6  ;;  %2808 = vmatpush.bf16.msrb.mxu1 %v4158_v7  ;;  %v5266_v5 = vld [vmem:[#allocation5 + $0x674] sm:$0xf0]  ;;  %v4349_v6 = vld [vmem:[#allocation5 + $0x768] sm:$0xf]  ;;  %v4094_v20 = vor.u32 %v5234_v3, %v4093_v0 }
  0xfe   :  { %2821 = vmatpush.bf16.msrb.mxu2 %v4286_v43  ;;  %2790 = vmatmul.bf16.vlgmr.msra.gmra.mxu3 %v5698_v15  ;;  %v5298_v7 = vld [vmem:[#allocation5 + $0x774] sm:$0xf0]  ;;  %v3966_v43 = vor.u32 %v5202_v63, %v3965_v62  ;;  %v4222_v10 = vor.u32 %v5266_v5, %v4221_v4  ;;  %v3949_v11 = vld [vmem:[#allocation5 + $0x448] sm:$0xf] }
  0xff   :  { %2834 = vmatpush.bf16.msrb.mxu3 %v4414_v13  ;;  %2777 = vmatmul.bf16.vlgmr.msra.gmra.mxu2 %v5694_v8  ;;  %v5198_v12 = vld [vmem:[#allocation5 + $0x454] sm:$0xf0]  ;;  %v4077_v13 = vld [vmem:[#allocation5 + $0x548] sm:$0xf]  ;;  %v4350_v14 = vor.u32 %v5298_v7, %v4349_v6 }
 0x100   :  { %v5230_v17 = vld [vmem:[#allocation5 + $0x554] sm:$0xf0]  ;;  %v4205_v19 = vld [vmem:[#allocation5 + $0x648] sm:$0xf]  ;;  %v3950_v31 = vor.u32 %v5198_v12, %v3949_v11 }
 0x101   :  { %2796 = vmatpush.bf16.msrb.mxu0 %v4014_v24  ;;  %2809 = vmatpush.bf16.msrb.mxu1 %v4142_v26  ;;  %v5262_v21 = vld [vmem:[#allocation5 + $0x654] sm:$0xf0]  ;;  %v2583_v26 = vpop.f32.mrf.mxu3  ;;  %v2546_v30 = vpop.f32.mrf.mxu0  ;;  %v4078_v36 = vor.u32 %v5230_v17, %v4077_v13  ;;  %v3933_v41 = vld [vmem:[#allocation5 + $0x428] sm:$0xf] }
 0x102   :  { %2822 = vmatpush.bf16.msrb.mxu2 %v4270_v28  ;;  %v2570_v16 = vpop.f32.mrf.mxu2  ;;  %v4333_v28 = vld [vmem:[#allocation5 + $0x748] sm:$0xf]  ;;  %v5294_v29 = vld [vmem:[#allocation5 + $0x754] sm:$0xf0]  ;;  %v4206_v39 = vor.u32 %v5262_v21, %v4205_v19 }
 0x103   :  { %2835 = vmatpush.bf16.msrb.mxu3 %v4398_v32  ;;  %v2571_v24 = vadd.f32 %v2570_v16, %v2558_v2  ;;  %v2559_v32 = vpop.f32.mrf.mxu1  ;;  %v5194_v42 = vld [vmem:[#allocation5 + $0x434] sm:$0xf0]  ;;  %v4189_v47 = vld [vmem:[#allocation5 + $0x628] sm:$0xf] }
 0x104   :  { %v5258_v48 = vld [vmem:[#allocation5 + $0x634] sm:$0xf0]  ;;  %v4317_v49 = vld [vmem:[#allocation5 + $0x728] sm:$0xf]  ;;  %v3934_v51 = vor.u32 %v5194_v42, %v3933_v41 }
 0x105   :  { %2797 = vmatpush.bf16.msrb.mxu0 %v3998_v44  ;;  %2810 = vmatpush.bf16.msrb.mxu1 %v4126_v45  ;;  %v5755_v33 = vadd.f32 %v2583_v26, %v2571_v24  ;;  %v4061_v44 = vld [vmem:[#allocation5 + $0x528] sm:$0xf]  ;;  %v4334_v45 = vor.u32 %v5294_v29, %v4333_v28  ;;  %v5190_v53 = vld [vmem:[#allocation5 + $0x414] sm:$0xf0]  ;;  %v4190_v55 = vor.u32 %v5258_v48, %v4189_v47 }
 0x106   :  { %2823 = vmatpush.bf16.msrb.mxu2 %v4254_v46  ;;  %v5226_v46 = vld [vmem:[#allocation5 + $0x534] sm:$0xf0]  ;;  %v3917_v52 = vld [vmem:[#allocation5 + $0x408] sm:$0xf] }
 0x107   :  { %2836 = vmatpush.bf16.msrb.mxu3 %v4382_v50  ;;  %v5290_v50 = vld [vmem:[#allocation5 + $0x734] sm:$0xf0]  ;;  %v4062_v54 = vor.u32 %v5226_v46, %v4061_v44  ;;  %v4045_v56 = vld [vmem:[#allocation5 + $0x508] sm:$0xf]  ;;  %v3918_v4 = vor.u32 %v5190_v53, %v3917_v52 }
 0x108   :  { %v5222_v57 = vld [vmem:[#allocation5 + $0x514] sm:$0xf0]  ;;  %v4318_v59 = vor.u32 %v5290_v50, %v4317_v49  ;;  %v4541_v0 = vld [vmem:[#allocation5 + $0x8e8] sm:$0xf] }
 0x109   :  { %2798 = vmatpush.bf16.msrb.mxu0 %v3982_v58  ;;  %2811 = vmatpush.bf16.msrb.mxu1 %v4110_v60  ;;  %v4173_v58 = vld [vmem:[#allocation5 + $0x608] sm:$0xf]  ;;  %v5254_v60 = vld [vmem:[#allocation5 + $0x614] sm:$0xf0]  ;;  %v2585_v3 = vpop.f32.mrf.mxu3 }
 0x10a   :  { %2824 = vmatpush.bf16.msrb.mxu2 %v4238_v61  ;;  %v4301_v61 = vld [vmem:[#allocation5 + $0x708] sm:$0xf]  ;;  %v5286_v62 = vld [vmem:[#allocation5 + $0x714] sm:$0xf0]  ;;  %v2572_v63 = vpop.f32.mrf.mxu2 }
 0x10b   :  { %2837 = vmatpush.bf16.msrb.mxu3 %v4366_v1  ;;  %v5346_v1 = vld [vmem:[#allocation5 + $0x8f4] sm:$0xf0]  ;;  %v4669_v2 = vld [vmem:[#allocation5 + $0x9e8] sm:$0xf]  ;;  %v4302_v12 = vor.u32 %v5286_v62, %v4301_v61 }
 0x10c   :  { %v5378_v5 = vld [vmem:[#allocation5 + $0x9f4] sm:$0xf0]  ;;  %v4797_v6 = vld [vmem:[#allocation5 + $0xae8] sm:$0xf]  ;;  %v4542_v13 = vor.u32 %v5346_v1, %v4541_v0 }
 0x10d   :  { %2799 = vmatpush.bf16.msrb.mxu0 %v3966_v43  ;;  %2812 = vmatpush.bf16.msrb.mxu1 %v4094_v20  ;;  %v5410_v7 = vld [vmem:[#allocation5 + $0xaf4] sm:$0xf0]  ;;  %v4046_v43 = vor.u32 %v5222_v57, %v4045_v56  ;;  %v4174_v20 = vor.u32 %v5254_v60, %v4173_v58  ;;  %v4525_v17 = vld [vmem:[#allocation5 + $0x8c8] sm:$0xf]  ;;  %v504_v57 = vperm.slane %v5738_v35, 1 }
 0x10e   :  { %2825 = vmatpush.bf16.msrb.mxu2 %v4222_v10  ;;  %v4925_v10 = vld [vmem:[#allocation5 + $0xbe8] sm:$0xf]  ;;  %v5442_v11 = vld [vmem:[#allocation5 + $0xbf4] sm:$0xf0]  ;;  %v4798_v16 = vor.u32 %v5410_v7, %v4797_v6 }
 0x10f   :  { %2838 = vmatpush.bf16.msrb.mxu3 %v4350_v14  ;;  %v4670_v14 = vor.u32 %v5378_v5, %v4669_v2  ;;  %v5342_v19 = vld [vmem:[#allocation5 + $0x8d4] sm:$0xf0]  ;;  %v4653_v21 = vld [vmem:[#allocation5 + $0x9c8] sm:$0xf]  ;;  %v4926_v24 = vor.u32 %v5442_v11, %v4925_v10 }
 0x110   :  { %v5374_v26 = vld [vmem:[#allocation5 + $0x9d4] sm:$0xf0]  ;;  %v4781_v28 = vld [vmem:[#allocation5 + $0xac8] sm:$0xf]  ;;  %v4526_v32 = vor.u32 %v5342_v19, %v4525_v17 }
 0x111   :  { %2800 = vmatpush.bf16.msrb.mxu0 %v3950_v31  ;;  %2813 = vmatpush.bf16.msrb.mxu1 %v4078_v36  ;;  %v5406_v29 = vld [vmem:[#allocation5 + $0xad4] sm:$0xf0]  ;;  %v4909_v30 = vld [vmem:[#allocation5 + $0xbc8] sm:$0xf]  ;;  %v4654_v36 = vor.u32 %v5374_v26, %v4653_v21 }
 0x112   :  { %2826 = vmatpush.bf16.msrb.mxu2 %v4206_v39  ;;  %v5438_v31 = vld [vmem:[#allocation5 + $0xbd4] sm:$0xf0]  ;;  %v4782_v39 = vor.u32 %v5406_v29, %v4781_v28  ;;  %v4509_v41 = vld [vmem:[#allocation5 + $0x8a8] sm:$0xf] }
 0x113   :  { %2839 = vmatpush.bf16.msrb.mxu3 %v4334_v45  ;;  %v5338_v42 = vld [vmem:[#allocation5 + $0x8b4] sm:$0xf0]  ;;  %v4637_v44 = vld [vmem:[#allocation5 + $0x9a8] sm:$0xf]  ;;  %v4910_v45 = vor.u32 %v5438_v31, %v4909_v30 }
 0x114   :  { %v5370_v46 = vld [vmem:[#allocation5 + $0x9b4] sm:$0xf0]  ;;  %v4765_v47 = vld [vmem:[#allocation5 + $0xaa8] sm:$0xf] }
 0x115   :  { %2801 = vmatpush.bf16.msrb.mxu0 %v3934_v51  ;;  %2814 = vmatpush.bf16.msrb.mxu1 %v4062_v54  ;;  %v5402_v48 = vld [vmem:[#allocation5 + $0xab4] sm:$0xf0]  ;;  %v4893_v49 = vld [vmem:[#allocation5 + $0xba8] sm:$0xf]  ;;  %v4510_v51 = vor.u32 %v5338_v42, %v4509_v41  ;;  %v4638_v53 = vor.u32 %v5370_v46, %v4637_v44 }
 0x116   :  { %2827 = vmatpush.bf16.msrb.mxu2 %v4190_v55  ;;  %v5434_v50 = vld [vmem:[#allocation5 + $0xbb4] sm:$0xf0]  ;;  %v4493_v52 = vld [vmem:[#allocation5 + $0x888] sm:$0xf]  ;;  %v4766_v54 = vor.u32 %v5402_v48, %v4765_v47 }
 0x117   :  { %2840 = vmatpush.bf16.msrb.mxu3 %v4318_v59  ;;  %v5334_v55 = vld [vmem:[#allocation5 + $0x894] sm:$0xf0]  ;;  %v4621_v56 = vld [vmem:[#allocation5 + $0x988] sm:$0xf]  ;;  %v4894_v58 = vor.u32 %v5434_v50, %v4893_v49 }
 0x118   :  { %v5366_v59 = vld [vmem:[#allocation5 + $0x994] sm:$0xf0]  ;;  %v4749_v60 = vld [vmem:[#allocation5 + $0xa88] sm:$0xf]  ;;  %v4494_v0 = vor.u32 %v5334_v55, %v4493_v52 }
 0x119   :  { %2802 = vmatpush.bf16.msrb.mxu0 %v3918_v4  ;;  %2815 = vmatpush.bf16.msrb.mxu1 %v4046_v43  ;;  %v5398_v61 = vld [vmem:[#allocation5 + $0xa94] sm:$0xf0]  ;;  %v4877_v62 = vld [vmem:[#allocation5 + $0xb88] sm:$0xf]  ;;  %v2596_v1 = vpop.f32.mrf.mxu0  ;;  %v4622_v2 = vor.u32 %v5366_v59, %v4621_v56  ;;  %v2609_v43 = vpop.f32.mrf.mxu1 }
 0x11a   :  { %2828 = vmatpush.bf16.msrb.mxu2 %v4174_v20  ;;  %v5430_v63 = vld [vmem:[#allocation5 + $0xb94] sm:$0xf0]  ;;  %v4750_v3 = vor.u32 %v5398_v61, %v4749_v60  ;;  %v4477_v4 = vld [vmem:[#allocation5 + $0x868] sm:$0xf]  ;;  %v2597_v7 = vadd.f32 %v2596_v1, %v504_v57 }
 0x11b   :  { %2841 = vmatpush.bf16.msrb.mxu3 %v4302_v12  ;;  %v5330_v5 = vld [vmem:[#allocation5 + $0x874] sm:$0xf0]  ;;  %v4605_v6 = vld [vmem:[#allocation5 + $0x968] sm:$0xf]  ;;  %v4878_v35 = vor.u32 %v5430_v63, %v4877_v62 }
 0x11c   :  { %2803 = vmatmul.bf16.vlgmr.msrb.gmra.mxu0 %v5708_v37  ;;  %2816 = vmatmul.bf16.vlgmr.msrb.gmra.mxu1 %v5712_v40  ;;  %v5362_v20 = vld [vmem:[#allocation5 + $0x974] sm:$0xf0]  ;;  %v4733_v10 = vld [vmem:[#allocation5 + $0xa68] sm:$0xf] }
 0x11d   :  { %2847 = vmatpush.bf16.msra.mxu0 %v4542_v13  ;;  %2860 = vmatpush.bf16.msra.mxu1 %v4670_v14  ;;  %v5394_v11 = vld [vmem:[#allocation5 + $0xa74] sm:$0xf0]  ;;  %v4861_v12 = vld [vmem:[#allocation5 + $0xb68] sm:$0xf]  ;;  %v2610_v14 = vadd.f32 %v2609_v43, %v2597_v7  ;;  %v4606_v17 = vor.u32 %v5362_v20, %v4605_v6  ;;  %v3519_v20 = vld [vmem:[#allocation5 + $0xf8] sm:$0xf0] }
 0x11e   :  { %2873 = vmatpush.bf16.msra.mxu2 %v4798_v16  ;;  %2842 = vmatmul.bf16.vlgmr.msrb.gmra.mxu3 %v5710_v38  ;;  %v5426_v13 = vld [vmem:[#allocation5 + $0xb74] sm:$0xf0]  ;;  %v4478_v16 = vor.u32 %v5330_v5, %v4477_v4  ;;  %v4734_v19 = vor.u32 %v5394_v11, %v4733_v10  ;;  %v4461_v21 = vld [vmem:[#allocation5 + $0x848] sm:$0xf]  ;;  %v5120_v10 = vld [vmem:[#allocation5 + $0x1ec] sm:$0xf] }
 0x11f   :  { %2886 = vmatpush.bf16.msra.mxu3 %v4926_v24  ;;  %2829 = vmatmul.bf16.vlgmr.msrb.gmra.mxu2 %v5706_v34  ;;  %v5326_v24 = vld [vmem:[#allocation5 + $0x854] sm:$0xf0]  ;;  %v4589_v26 = vld [vmem:[#allocation5 + $0x948] sm:$0xf]  ;;  %v4862_v29 = vor.u32 %v5426_v13, %v4861_v12  ;;  %v3647_v12 = vld [vmem:[#allocation5 + $0x1f8] sm:$0xf0] }
 0x120   :  { %v5358_v30 = vld [vmem:[#allocation5 + $0x954] sm:$0xf0]  ;;  %v4717_v31 = vld [vmem:[#allocation5 + $0xa48] sm:$0xf]  ;;  %v4462_v44 = vor.u32 %v5326_v24, %v4461_v21  ;;  %v5152_v13 = vld [vmem:[#allocation5 + $0x2ec] sm:$0xf] }
 0x121   :  { %2848 = vmatpush.bf16.msra.mxu0 %v4526_v32  ;;  %2861 = vmatpush.bf16.msra.mxu1 %v4654_v36  ;;  %v5390_v32 = vld [vmem:[#allocation5 + $0xa54] sm:$0xf0]  ;;  %v4845_v41 = vld [vmem:[#allocation5 + $0xb48] sm:$0xf]  ;;  %v2598_v46 = vpop.f32.mrf.mxu0  ;;  %v4590_v47 = vor.u32 %v5358_v30, %v4589_v26  ;;  %v2611_v52 = vpop.f32.mrf.mxu1  ;;  %v3903_v21 = vld [vmem:[#allocation5 + $0x3f8] sm:$0xf0] }
 0x122   :  { %2874 = vmatpush.bf16.msra.mxu2 %v4782_v39  ;;  %v2622_v28 = vpop.f32.mrf.mxu2  ;;  %v2635_v39 = vpop.f32.mrf.mxu3  ;;  %v5422_v42 = vld [vmem:[#allocation5 + $0xb54] sm:$0xf0]  ;;  %v4718_v48 = vor.u32 %v5390_v32, %v4717_v31  ;;  %v4445_v49 = vld [vmem:[#allocation5 + $0x828] sm:$0xf]  ;;  %v5084_v30 = vld [vmem:[#allocation5 + $0xcc] sm:$0xf] }
 0x123   :  { %2887 = vmatpush.bf16.msra.mxu3 %v4910_v45  ;;  %v2623_v36 = vadd.f32 %v2622_v28, %v2610_v14  ;;  %v5322_v50 = vld [vmem:[#allocation5 + $0x834] sm:$0xf0]  ;;  %v4701_v55 = vld [vmem:[#allocation5 + $0xa28] sm:$0xf]  ;;  %v3775_v14 = vld [vmem:[#allocation5 + $0x2f8] sm:$0xf0]  ;;  %v3650_v28 = vor.u32 %v5120_v10, %v3647_v12 }
 0x124   :  { %v5386_v56 = vld [vmem:[#allocation5 + $0xa34] sm:$0xf0]  ;;  %v4829_v57 = vld [vmem:[#allocation5 + $0xb28] sm:$0xf]  ;;  %v4446_v59 = vor.u32 %v5322_v50, %v4445_v49  ;;  %v3503_v31 = vld [vmem:[#allocation5 + $0xd8] sm:$0xf0] }
 0x125   :  { %2849 = vmatpush.bf16.msra.mxu0 %v4510_v51  ;;  %2862 = vmatpush.bf16.msra.mxu1 %v4638_v53  ;;  %v5762_v45 = vadd.f32 %v2635_v39, %v2623_v36  ;;  %v4573_v51 = vld [vmem:[#allocation5 + $0x928] sm:$0xf]  ;;  %v4846_v53 = vor.u32 %v5422_v42, %v4845_v41  ;;  %v5318_v61 = vld [vmem:[#allocation5 + $0x814] sm:$0xf0]  ;;  %v4702_v63 = vor.u32 %v5386_v56, %v4701_v55  ;;  %v5116_v32 = vld [vmem:[#allocation5 + $0x1cc] sm:$0xf] }
 0x126   :  { %2875 = vmatpush.bf16.msra.mxu2 %v4766_v54  ;;  %v5354_v54 = vld [vmem:[#allocation5 + $0x934] sm:$0xf0]  ;;  %v4429_v60 = vld [vmem:[#allocation5 + $0x808] sm:$0xf]  ;;  %v3631_v39 = vld [vmem:[#allocation5 + $0x1d8] sm:$0xf0] }
 0x127   :  { %2888 = vmatpush.bf16.msra.mxu3 %v4894_v58  ;;  %v5418_v58 = vld [vmem:[#allocation5 + $0xb34] sm:$0xf0]  ;;  %v4574_v62 = vor.u32 %v5354_v54, %v4573_v51  ;;  %v4813_v6 = vld [vmem:[#allocation5 + $0xb08] sm:$0xf]  ;;  %v4430_v11 = vor.u32 %v5318_v61, %v4429_v60  ;;  %v5148_v41 = vld [vmem:[#allocation5 + $0x2cc] sm:$0xf] }
 0x128   :  { %v5350_v1 = vld [vmem:[#allocation5 + $0x914] sm:$0xf0]  ;;  %v4830_v4 = vor.u32 %v5418_v58, %v4829_v57  ;;  %v3759_v42 = vld [vmem:[#allocation5 + $0x2d8] sm:$0xf0]  ;;  %v5080_v50 = vld [vmem:[#allocation5 + $0xac] sm:$0xf] }
 0x129   :  { %2850 = vmatpush.bf16.msra.mxu0 %v4494_v0  ;;  %2863 = vmatpush.bf16.msra.mxu1 %v4622_v2  ;;  %v4557_v0 = vld [vmem:[#allocation5 + $0x908] sm:$0xf]  ;;  %v5382_v5 = vld [vmem:[#allocation5 + $0xa14] sm:$0xf0]  ;;  %v3887_v46 = vld [vmem:[#allocation5 + $0x3d8] sm:$0xf0]  ;;  %v3762_v49 = vor.u32 %v5148_v41, %v3759_v42 }
 0x12a   :  { %2876 = vmatpush.bf16.msra.mxu2 %v4750_v3  ;;  %v4685_v2 = vld [vmem:[#allocation5 + $0xa08] sm:$0xf]  ;;  %v2624_v3 = vpop.f32.mrf.mxu2  ;;  %v5414_v7 = vld [vmem:[#allocation5 + $0xb14] sm:$0xf0]  ;;  %v2637_v43 = vpop.f32.mrf.mxu3  ;;  %v3487_v51 = vld [vmem:[#allocation5 + $0xb8] sm:$0xf0] }
 0x12b   :  { %2889 = vmatpush.bf16.msra.mxu3 %v4878_v35  ;;  %v5088_v35 = vld [vmem:[#allocation5 + $0xec] sm:$0xf]  ;;  %v4814_v24 = vor.u32 %v5414_v7, %v4813_v6  ;;  %v3615_v54 = vld [vmem:[#allocation5 + $0x1b8] sm:$0xf0] }
 0x12c   :  { %v3522_v26 = vor.u32 %v5088_v35, %v3519_v20  ;;  %v5112_v52 = vld [vmem:[#allocation5 + $0x1ac] sm:$0xf]  ;;  %v3743_v56 = vld [vmem:[#allocation5 + $0x2b8] sm:$0xf0] }
 0x12d   :  { %2851 = vmatpush.bf16.msra.mxu0 %v4478_v16  ;;  %2864 = vmatpush.bf16.msra.mxu1 %v4606_v17  ;;  %v4558_v16 = vor.u32 %v5350_v1, %v4557_v0  ;;  %v4686_v17 = vor.u32 %v5382_v5, %v4685_v2  ;;  %v5144_v55 = vld [vmem:[#allocation5 + $0x2ac] sm:$0xf]  ;;  %v3871_v58 = vld [vmem:[#allocation5 + $0x3b8] sm:$0xf0]  ;;  %v3618_v60 = vor.u32 %v5112_v52, %v3615_v54 }
 0x12e   :  { %2877 = vmatpush.bf16.msra.mxu2 %v4734_v19  ;;  %v5184_v19 = vld [vmem:[#allocation5 + $0x3ec] sm:$0xf]  ;;  %v3746_v61 = vor.u32 %v5144_v55, %v3743_v56  ;;  %v3599_v2 = vld [vmem:[#allocation5 + $0x198] sm:$0xf0] }
 0x12f   :  { %2890 = vmatpush.bf16.msra.mxu3 %v4862_v29  ;;  %v3778_v29 = vor.u32 %v5152_v13, %v3775_v14  ;;  %v3906_v36 = vor.u32 %v5184_v19, %v3903_v21  ;;  %v5176_v57 = vld [vmem:[#allocation5 + $0x3ac] sm:$0xf]  ;;  %v3855_v6 = vld [vmem:[#allocation5 + $0x398] sm:$0xf0] }
 0x130   :  { %v5108_v0 = vld [vmem:[#allocation5 + $0x18c] sm:$0xf]  ;;  %v3874_v1 = vor.u32 %v5176_v57, %v3871_v58  ;;  %v3711_v21 = vld [vmem:[#allocation5 + $0x278] sm:$0xf0] }
 0x131   :  { %2852 = vmatpush.bf16.msra.mxu0 %v4462_v44  ;;  %2865 = vmatpush.bf16.msra.mxu1 %v4590_v47  ;;  %v5180_v44 = vld [vmem:[#allocation5 + $0x3cc] sm:$0xf]  ;;  %v3506_v47 = vor.u32 %v5084_v30, %v3503_v31  ;;  %v3602_v35 = vor.u32 %v5108_v0, %v3599_v2  ;;  %v3567_v42 = vld [vmem:[#allocation5 + $0x158] sm:$0xf0] }
 0x132   :  { %2878 = vmatpush.bf16.msra.mxu2 %v4718_v48  ;;  %v3634_v48 = vor.u32 %v5116_v32, %v3631_v39  ;;  %v5140_v3 = vld [vmem:[#allocation5 + $0x28c] sm:$0xf]  ;;  %v3423_v57 = vld [vmem:[#allocation5 + $0x38] sm:$0xf0] }
 0x133   :  { %2891 = vmatpush.bf16.msra.mxu3 %v4846_v53  ;;  %v3890_v53 = vor.u32 %v5180_v44, %v3887_v46  ;;  %v5172_v5 = vld [vmem:[#allocation5 + $0x38c] sm:$0xf]  ;;  %v3695_v46 = vld [vmem:[#allocation5 + $0x258] sm:$0xf0] }
 0x134   :  { %v5072_v10 = vld [vmem:[#allocation5 + $0x6c] sm:$0xf] }
 0x135   :  { %2853 = vmatpush.bf16.msra.mxu0 %v4446_v59  ;;  %2866 = vmatpush.bf16.msra.mxu1 %v4574_v62  ;;  %v3490_v59 = vor.u32 %v5080_v50, %v3487_v51  ;;  %v5076_v62 = vld [vmem:[#allocation5 + $0x8c] sm:$0xf]  ;;  %v3823_v50 = vld [vmem:[#allocation5 + $0x358] sm:$0xf0] }
 0x136   :  { %2879 = vmatpush.bf16.msra.mxu2 %v4702_v63  ;;  %v3471_v63 = vld [vmem:[#allocation5 + $0x98] sm:$0xf0]  ;;  %v5104_v12 = vld [vmem:[#allocation5 + $0x16c] sm:$0xf] }
 0x137   :  { %2892 = vmatpush.bf16.msra.mxu3 %v4830_v4  ;;  %v3727_v4 = vld [vmem:[#allocation5 + $0x298] sm:$0xf0]  ;;  %v3474_v7 = vor.u32 %v5076_v62, %v3471_v63  ;;  %v5136_v19 = vld [vmem:[#allocation5 + $0x26c] sm:$0xf] }
 0x138   :  { %v3730_v20 = vor.u32 %v5140_v3, %v3727_v4  ;;  %v3714_v31 = vor.u32 %v5136_v19, %v3711_v21  ;;  %v5068_v32 = vld [vmem:[#allocation5 + $0x4c] sm:$0xf]  ;;  %v3679_v63 = vld [vmem:[#allocation5 + $0x238] sm:$0xf0] }
 0x139   :  { %2854 = vmatpush.bf16.msra.mxu0 %v4430_v11  ;;  %2867 = vmatpush.bf16.msra.mxu1 %v4558_v16  ;;  %v2648_v43 = vpop.f32.mrf.mxu0  ;;  %v3455_v11 = vld [vmem:[#allocation5 + $0x78] sm:$0xf0]  ;;  %v2661_v14 = vpop.f32.mrf.mxu1  ;;  %v3858_v16 = vor.u32 %v5172_v5, %v3855_v6  ;;  %v5100_v39 = vld [vmem:[#allocation5 + $0x14c] sm:$0xf] }
 0x13a   :  { %2880 = vmatpush.bf16.msra.mxu2 %v4686_v17  ;;  %v2649_v13 = vadd.f32 %v2648_v43, %v5762_v45  ;;  %v3583_v17 = vld [vmem:[#allocation5 + $0x178] sm:$0xf0]  ;;  %v5132_v44 = vld [vmem:[#allocation5 + $0x24c] sm:$0xf]  ;;  %v3570_v54 = vor.u32 %v5100_v39, %v3567_v42 }
 0x13b   :  { %2893 = vmatpush.bf16.msra.mxu3 %v4814_v24  ;;  %v5168_v24 = vld [vmem:[#allocation5 + $0x36c] sm:$0xf]  ;;  %v3586_v30 = vor.u32 %v5104_v12, %v3583_v17  ;;  %v3698_v55 = vor.u32 %v5132_v44, %v3695_v46  ;;  %v3407_v4 = vld [vmem:[#allocation5 + $0x18] sm:$0xf0] }
 0x13c   :  { %2855 = vmatmul.bf16.vlgmr.msra.gmra.mxu0 %v5718_v18  ;;  %2868 = vmatmul.bf16.vlgmr.msra.gmra.mxu1 %v5722_v23  ;;  %v5064_v56 = vld [vmem:[#allocation5 + $0x2c] sm:$0xf]  ;;  %v3535_v43 = vld [vmem:[#allocation5 + $0x118] sm:$0xf0] }
 0x13d   :  { %2899 = vmatpush.bf16.msrb.mxu0 %v3522_v26  ;;  %2912 = vmatpush.bf16.msrb.mxu1 %v3650_v28  ;;  %v3839_v26 = vld [vmem:[#allocation5 + $0x378] sm:$0xf0]  ;;  %v2662_v28 = vadd.f32 %v2661_v14, %v2649_v13  ;;  %v5096_v58 = vld [vmem:[#allocation5 + $0x12c] sm:$0xf]  ;;  %v3426_v2 = vor.u32 %v5064_v56, %v3423_v57 }
 0x13e   :  { %2925 = vmatpush.bf16.msrb.mxu2 %v3778_v29  ;;  %2894 = vmatmul.bf16.vlgmr.msra.gmra.mxu3 %v5724_v27  ;;  %v3458_v29 = vor.u32 %v5072_v10, %v3455_v11  ;;  %v3842_v45 = vor.u32 %v5168_v24, %v3839_v26  ;;  %v5128_v62 = vld [vmem:[#allocation5 + $0x22c] sm:$0xf]  ;;  %v3663_v11 = vld [vmem:[#allocation5 + $0x218] sm:$0xf0] }
 0x13f   :  { %2938 = vmatpush.bf16.msrb.mxu3 %v3906_v36  ;;  %2881 = vmatmul.bf16.vlgmr.msra.gmra.mxu2 %v5720_v22  ;;  %v3439_v36 = vld [vmem:[#allocation5 + $0x58] sm:$0xf0]  ;;  %v5160_v0 = vld [vmem:[#allocation5 + $0x32c] sm:$0xf]  ;;  %v3682_v6 = vor.u32 %v5128_v62, %v3679_v63 }
 0x140   :  { %v3442_v51 = vor.u32 %v5068_v32, %v3439_v36  ;;  %v5060_v3 = vld [vmem:[#allocation5 + $0xc] sm:$0xf]  ;;  %v3791_v13 = vld [vmem:[#allocation5 + $0x318] sm:$0xf0] }
 0x141   :  { %2900 = vmatpush.bf16.msrb.mxu0 %v3506_v47  ;;  %2913 = vmatpush.bf16.msrb.mxu1 %v3634_v48  ;;  %v2687_v48 = vpop.f32.mrf.mxu3  ;;  %v5156_v12 = vld [vmem:[#allocation5 + $0x30c] sm:$0xf]  ;;  %v4031_v17 = vld [vmem:[#allocation5 + $0x4f8] sm:$0xf0]  ;;  %v3410_v21 = vor.u32 %v5060_v3, %v3407_v4 }
 0x142   :  { %2926 = vmatpush.bf16.msrb.mxu2 %v3762_v49  ;;  %v2674_v41 = vpop.f32.mrf.mxu2  ;;  %v5164_v49 = vld [vmem:[#allocation5 + $0x34c] sm:$0xf]  ;;  %v4159_v24 = vld [vmem:[#allocation5 + $0x5f8] sm:$0xf0]  ;;  %v3794_v36 = vor.u32 %v5156_v12, %v3791_v13 }
 0x143   :  { %2939 = vmatpush.bf16.msrb.mxu3 %v3890_v53  ;;  %v2675_v47 = vadd.f32 %v2674_v41, %v2662_v28  ;;  %v2650_v53 = vpop.f32.mrf.mxu0  ;;  %v5248_v19 = vld [vmem:[#allocation5 + $0x5ec] sm:$0xf]  ;;  %v4287_v28 = vld [vmem:[#allocation5 + $0x6f8] sm:$0xf0] }
 0x144   :  { %v5280_v26 = vld [vmem:[#allocation5 + $0x6ec] sm:$0xf]  ;;  %v4415_v32 = vld [vmem:[#allocation5 + $0x7f8] sm:$0xf0]  ;;  %v4162_v41 = vor.u32 %v5248_v19, %v4159_v24 }
 0x145   :  { %2901 = vmatpush.bf16.msrb.mxu0 %v3490_v59  ;;  %2914 = vmatpush.bf16.msrb.mxu1 %v3618_v60  ;;  %v5769_v52 = vadd.f32 %v2687_v48, %v2675_v47  ;;  %v2663_v59 = vpop.f32.mrf.mxu1  ;;  %v3826_v60 = vor.u32 %v5164_v49, %v3823_v50  ;;  %v5212_v42 = vld [vmem:[#allocation5 + $0x4cc] sm:$0xf]  ;;  %v4015_v44 = vld [vmem:[#allocation5 + $0x4d8] sm:$0xf0] }
 0x146   :  { %2927 = vmatpush.bf16.msrb.mxu2 %v3746_v61  ;;  %v3551_v61 = vld [vmem:[#allocation5 + $0x138] sm:$0xf0]  ;;  %v5244_v46 = vld [vmem:[#allocation5 + $0x5cc] sm:$0xf] }
 0x147   :  { %2940 = vmatpush.bf16.msrb.mxu3 %v3874_v1  ;;  %v3807_v1 = vld [vmem:[#allocation5 + $0x338] sm:$0xf0]  ;;  %v3554_v5 = vor.u32 %v5096_v58, %v3551_v61  ;;  %v5276_v49 = vld [vmem:[#allocation5 + $0x6cc] sm:$0xf] }
 0x148   :  { %v3810_v10 = vor.u32 %v5160_v0, %v3807_v1  ;;  %v4143_v48 = vld [vmem:[#allocation5 + $0x5d8] sm:$0xf0]  ;;  %v5208_v57 = vld [vmem:[#allocation5 + $0x4ac] sm:$0xf] }
 0x149   :  { %2902 = vmatpush.bf16.msrb.mxu0 %v3474_v7  ;;  %2915 = vmatpush.bf16.msrb.mxu1 %v3602_v35  ;;  %v5092_v7 = vld [vmem:[#allocation5 + $0x10c] sm:$0xf]  ;;  %v2689_v14 = vpop.f32.mrf.mxu3  ;;  %v4271_v50 = vld [vmem:[#allocation5 + $0x6d8] sm:$0xf0] }
 0x14a   :  { %2928 = vmatpush.bf16.msrb.mxu2 %v3730_v20  ;;  %v5124_v35 = vld [vmem:[#allocation5 + $0x20c] sm:$0xf]  ;;  %v2676_v20 = vpop.f32.mrf.mxu2  ;;  %v4399_v53 = vld [vmem:[#allocation5 + $0x7d8] sm:$0xf0]  ;;  %v4274_v56 = vor.u32 %v5276_v49, %v4271_v50 }
 0x14b   :  { %2941 = vmatpush.bf16.msrb.mxu3 %v3858_v16  ;;  %v5216_v16 = vld [vmem:[#allocation5 + $0x4ec] sm:$0xf]  ;;  %v3999_v58 = vld [vmem:[#allocation5 + $0x4b8] sm:$0xf0] }
 0x14c   :  { %v4034_v39 = vor.u32 %v5216_v16, %v4031_v17  ;;  %v5240_v59 = vld [vmem:[#allocation5 + $0x5ac] sm:$0xf]  ;;  %v4127_v61 = vld [vmem:[#allocation5 + $0x5b8] sm:$0xf0] }
 0x14d   :  { %2903 = vmatpush.bf16.msrb.mxu0 %v3458_v29  ;;  %2916 = vmatpush.bf16.msrb.mxu1 %v3586_v30  ;;  %v3538_v29 = vor.u32 %v5092_v7, %v3535_v43  ;;  %v3666_v30 = vor.u32 %v5124_v35, %v3663_v11  ;;  %v5272_v62 = vld [vmem:[#allocation5 + $0x6ac] sm:$0xf]  ;;  %v4255_v63 = vld [vmem:[#allocation5 + $0x6b8] sm:$0xf0]  ;;  %v4130_v3 = vor.u32 %v5240_v59, %v4127_v61 }
 0x14e   :  { %2929 = vmatpush.bf16.msrb.mxu2 %v3714_v31  ;;  %v5312_v31 = vld [vmem:[#allocation5 + $0x7ec] sm:$0xf]  ;;  %v4383_v1 = vld [vmem:[#allocation5 + $0x7b8] sm:$0xf0]  ;;  %v4258_v4 = vor.u32 %v5272_v62, %v4255_v63 }
 0x14f   :  { %2942 = vmatpush.bf16.msrb.mxu3 %v3842_v45  ;;  %v4290_v45 = vor.u32 %v5280_v26, %v4287_v28  ;;  %v4418_v47 = vor.u32 %v5312_v31, %v4415_v32  ;;  %v5304_v0 = vld [vmem:[#allocation5 + $0x7ac] sm:$0xf]  ;;  %v4239_v20 = vld [vmem:[#allocation5 + $0x698] sm:$0xf0] }
 0x150   :  { %v5236_v7 = vld [vmem:[#allocation5 + $0x58c] sm:$0xf]  ;;  %v4386_v43 = vor.u32 %v5304_v0, %v4383_v1  ;;  %v4367_v11 = vld [vmem:[#allocation5 + $0x798] sm:$0xf0] }
 0x151   :  { %2904 = vmatpush.bf16.msrb.mxu0 %v3442_v51  ;;  %2917 = vmatpush.bf16.msrb.mxu1 %v3570_v54  ;;  %v5308_v51 = vld [vmem:[#allocation5 + $0x7cc] sm:$0xf]  ;;  %v4018_v54 = vor.u32 %v5212_v42, %v4015_v44  ;;  %v3967_v17 = vld [vmem:[#allocation5 + $0x478] sm:$0xf0] }
 0x152   :  { %2930 = vmatpush.bf16.msrb.mxu2 %v3698_v55  ;;  %v4146_v55 = vor.u32 %v5244_v46, %v4143_v48  ;;  %v5268_v35 = vld [vmem:[#allocation5 + $0x68c] sm:$0xf]  ;;  %v4095_v26 = vld [vmem:[#allocation5 + $0x578] sm:$0xf0] }
 0x153   :  { %2943 = vmatpush.bf16.msrb.mxu3 %v3826_v60  ;;  %v4402_v60 = vor.u32 %v5308_v51, %v4399_v53  ;;  %v4242_v14 = vor.u32 %v5268_v35, %v4239_v20  ;;  %v5200_v16 = vld [vmem:[#allocation5 + $0x46c] sm:$0xf]  ;;  %v4351_v31 = vld [vmem:[#allocation5 + $0x778] sm:$0xf0] }
 0x154   :  { %v5232_v19 = vld [vmem:[#allocation5 + $0x56c] sm:$0xf]  ;;  %v3970_v32 = vor.u32 %v5200_v16, %v3967_v17  ;;  %v4079_v46 = vld [vmem:[#allocation5 + $0x558] sm:$0xf0] }
 0x155   :  { %2905 = vmatpush.bf16.msrb.mxu0 %v3426_v2  ;;  %2918 = vmatpush.bf16.msrb.mxu1 %v3554_v5  ;;  %v4002_v2 = vor.u32 %v5208_v57, %v3999_v58  ;;  %v5204_v5 = vld [vmem:[#allocation5 + $0x48c] sm:$0xf]  ;;  %v4207_v48 = vld [vmem:[#allocation5 + $0x658] sm:$0xf0] }
 0x156   :  { %2931 = vmatpush.bf16.msrb.mxu2 %v3682_v6  ;;  %v3983_v6 = vld [vmem:[#allocation5 + $0x498] sm:$0xf0]  ;;  %v5264_v28 = vld [vmem:[#allocation5 + $0x66c] sm:$0xf] }
 0x157   :  { %2944 = vmatpush.bf16.msrb.mxu3 %v3810_v10  ;;  %v3986_v12 = vor.u32 %v5204_v5, %v3983_v6  ;;  %v5292_v51 = vld [vmem:[#allocation5 + $0x74c] sm:$0xf]  ;;  %v4335_v53 = vld [vmem:[#allocation5 + $0x758] sm:$0xf0] }
 0x158   :  { %v3935_v61 = vld [vmem:[#allocation5 + $0x438] sm:$0xf0]  ;;  %v5224_v62 = vld [vmem:[#allocation5 + $0x52c] sm:$0xf]  ;;  %v4338_v63 = vor.u32 %v5292_v51, %v4335_v53 }
 0x159   :  { %2906 = vmatpush.bf16.msrb.mxu0 %v3410_v21  ;;  %2919 = vmatpush.bf16.msrb.mxu1 %v3538_v29  ;;  %v2700_v10 = vpop.f32.mrf.mxu0  ;;  %v4223_v29 = vld [vmem:[#allocation5 + $0x678] sm:$0xf0]  ;;  %v5256_v1 = vld [vmem:[#allocation5 + $0x62c] sm:$0xf] }
 0x15a   :  { %2932 = vmatpush.bf16.msrb.mxu2 %v3666_v30  ;;  %v5296_v30 = vld [vmem:[#allocation5 + $0x76c] sm:$0xf]  ;;  %v4063_v0 = vld [vmem:[#allocation5 + $0x538] sm:$0xf0] }
 0x15b   :  { %2945 = vmatpush.bf16.msrb.mxu3 %v3794_v36  ;;  %v4226_v36 = vor.u32 %v5264_v28, %v4223_v29  ;;  %v4354_v42 = vor.u32 %v5296_v30, %v4351_v31  ;;  %v5188_v6 = vld [vmem:[#allocation5 + $0x40c] sm:$0xf]  ;;  %v4047_v20 = vld [vmem:[#allocation5 + $0x518] sm:$0xf0] }
 0x15c   :  { %2907 = vmatmul.bf16.vlgmr.msrb.gmra.mxu0 %v5696_v9  ;;  %2920 = vmatmul.bf16.vlgmr.msrb.gmra.mxu1 %v5703_v25  ;;  %v5300_v9 = vld [vmem:[#allocation5 + $0x78c] sm:$0xf]  ;;  %v2713_v25 = vpop.f32.mrf.mxu1  ;;  %v4927_v31 = vld [vmem:[#allocation5 + $0xbf8] sm:$0xf0] }
 0x15d   :  { %2951 = vmatpush.bf16.msra.mxu0 %v4034_v39  ;;  %2964 = vmatpush.bf16.msra.mxu1 %v4162_v41  ;;  %v4370_v21 = vor.u32 %v5300_v9, %v4367_v11  ;;  %v5196_v39 = vld [vmem:[#allocation5 + $0x44c] sm:$0xf]  ;;  %v3951_v41 = vld [vmem:[#allocation5 + $0x458] sm:$0xf0] }
 0x15e   :  { %2977 = vmatpush.bf16.msra.mxu2 %v4290_v45  ;;  %2946 = vmatmul.bf16.vlgmr.msrb.gmra.mxu3 %v5698_v15  ;;  %v2701_v15 = vadd.f32 %v2700_v10, %v5769_v52  ;;  %v4098_v52 = vor.u32 %v5232_v19, %v4095_v26  ;;  %v5228_v45 = vld [vmem:[#allocation5 + $0x54c] sm:$0xf]  ;;  %v4175_v11 = vld [vmem:[#allocation5 + $0x618] sm:$0xf0] }
 0x15f   :  { %2990 = vmatpush.bf16.msra.mxu3 %v4418_v47  ;;  %2933 = vmatmul.bf16.vlgmr.msrb.gmra.mxu2 %v5694_v8  ;;  %v4111_v8 = vld [vmem:[#allocation5 + $0x598] sm:$0xf0]  ;;  %v5260_v47 = vld [vmem:[#allocation5 + $0x64c] sm:$0xf]  ;;  %v4082_v58 = vor.u32 %v5228_v45, %v4079_v46 }
 0x160   :  { %v4114_v13 = vor.u32 %v5236_v7, %v4111_v8  ;;  %v2714_v24 = vadd.f32 %v2713_v25, %v2701_v15  ;;  %v4210_v59 = vor.u32 %v5260_v47, %v4207_v48  ;;  %v3919_v7 = vld [vmem:[#allocation5 + $0x418] sm:$0xf0]  ;;  %v5220_v35 = vld [vmem:[#allocation5 + $0x50c] sm:$0xf] }
 0x161   :  { %2952 = vmatpush.bf16.msra.mxu0 %v4018_v54  ;;  %2965 = vmatpush.bf16.msra.mxu1 %v4146_v55  ;;  %v2739_v50 = vpop.f32.mrf.mxu3  ;;  %v2702_v54 = vpop.f32.mrf.mxu0  ;;  %v3954_v55 = vor.u32 %v5196_v39, %v3951_v41  ;;  %v5252_v10 = vld [vmem:[#allocation5 + $0x60c] sm:$0xf]  ;;  %v3922_v19 = vor.u32 %v5188_v6, %v3919_v7  ;;  %v4799_v26 = vld [vmem:[#allocation5 + $0xaf8] sm:$0xf0]  ;;  %v4050_v28 = vor.u32 %v5220_v35, %v4047_v20 }
 0x162   :  { %2978 = vmatpush.bf16.msra.mxu2 %v4274_v56  ;;  %v2726_v44 = vpop.f32.mrf.mxu2  ;;  %v5284_v15 = vld [vmem:[#allocation5 + $0x70c] sm:$0xf]  ;;  %v4178_v29 = vor.u32 %v5252_v10, %v4175_v11  ;;  %v4527_v45 = vld [vmem:[#allocation5 + $0x8d8] sm:$0xf0] }
 0x163   :  { %2991 = vmatpush.bf16.msra.mxu3 %v4402_v60  ;;  %v2727_v49 = vadd.f32 %v2726_v44, %v2714_v24  ;;  %v5192_v60 = vld [vmem:[#allocation5 + $0x42c] sm:$0xf]  ;;  %v4655_v46 = vld [vmem:[#allocation5 + $0x9d8] sm:$0xf0] }
 0x164   :  { %v2715_v56 = vpop.f32.mrf.mxu1  ;;  %v3938_v5 = vor.u32 %v5192_v60, %v3935_v61  ;;  %v5376_v16 = vld [vmem:[#allocation5 + $0x9ec] sm:$0xf]  ;;  %v4783_v48 = vld [vmem:[#allocation5 + $0xad8] sm:$0xf0] }
 0x165   :  { %2953 = vmatpush.bf16.msra.mxu0 %v4002_v2  ;;  %2966 = vmatpush.bf16.msra.mxu1 %v4130_v3  ;;  %v5776_v57 = vadd.f32 %v2739_v50, %v2727_v49  ;;  %v4191_v2 = vld [vmem:[#allocation5 + $0x638] sm:$0xf0]  ;;  %v5288_v3 = vld [vmem:[#allocation5 + $0x72c] sm:$0xf] }
 0x166   :  { %2979 = vmatpush.bf16.msra.mxu2 %v4258_v4  ;;  %v4319_v4 = vld [vmem:[#allocation5 + $0x738] sm:$0xf0]  ;;  %v4194_v8 = vor.u32 %v5256_v1, %v4191_v2  ;;  %v5408_v24 = vld [vmem:[#allocation5 + $0xaec] sm:$0xf] }
 0x167   :  { %2992 = vmatpush.bf16.msra.mxu3 %v4386_v43  ;;  %v4066_v43 = vor.u32 %v5224_v62, %v4063_v0  ;;  %v4322_v9 = vor.u32 %v5288_v3, %v4319_v4  ;;  %v5440_v30 = vld [vmem:[#allocation5 + $0xbec] sm:$0xf]  ;;  %v4802_v39 = vor.u32 %v5408_v24, %v4799_v26  ;;  %v4911_v50 = vld [vmem:[#allocation5 + $0xbd8] sm:$0xf0] }
 0x168   :  { %v5340_v41 = vld [vmem:[#allocation5 + $0x8cc] sm:$0xf]  ;;  %v4930_v44 = vor.u32 %v5440_v30, %v4927_v31  ;;  %v4511_v56 = vld [vmem:[#allocation5 + $0x8b8] sm:$0xf0] }
 0x169   :  { %2954 = vmatpush.bf16.msra.mxu0 %v3986_v12  ;;  %2967 = vmatpush.bf16.msra.mxu1 %v4114_v13  ;;  %v4303_v12 = vld [vmem:[#allocation5 + $0x718] sm:$0xf0]  ;;  %v5344_v13 = vld [vmem:[#allocation5 + $0x8ec] sm:$0xf]  ;;  %v2741_v17 = vpop.f32.mrf.mxu3  ;;  %v4530_v51 = vor.u32 %v5340_v41, %v4527_v45 }
 0x16a   :  { %2980 = vmatpush.bf16.msra.mxu2 %v4242_v14  ;;  %v2728_v25 = vpop.f32.mrf.mxu2  ;;  %v4543_v14 = vld [vmem:[#allocation5 + $0x8f8] sm:$0xf0]  ;;  %v5404_v47 = vld [vmem:[#allocation5 + $0xacc] sm:$0xf] }
 0x16b   :  { %2993 = vmatpush.bf16.msra.mxu3 %v4370_v21  ;;  %v4671_v21 = vld [vmem:[#allocation5 + $0x9f8] sm:$0xf0]  ;;  %v5436_v49 = vld [vmem:[#allocation5 + $0xbcc] sm:$0xf]  ;;  %v4786_v54 = vor.u32 %v5404_v47, %v4783_v48 }
 0x16c   :  { %v4639_v60 = vld [vmem:[#allocation5 + $0x9b8] sm:$0xf0]  ;;  %v5400_v61 = vld [vmem:[#allocation5 + $0xaac] sm:$0xf] }
 0x16d   :  { %2955 = vmatpush.bf16.msra.mxu0 %v3970_v32  ;;  %2968 = vmatpush.bf16.msra.mxu1 %v4098_v52  ;;  %v4306_v32 = vor.u32 %v5284_v15, %v4303_v12  ;;  %v4546_v52 = vor.u32 %v5344_v13, %v4543_v14  ;;  %v4767_v62 = vld [vmem:[#allocation5 + $0xab8] sm:$0xf0]  ;;  %v5332_v4 = vld [vmem:[#allocation5 + $0x88c] sm:$0xf] }
 0x16e   :  { %2981 = vmatpush.bf16.msra.mxu2 %v4226_v36  ;;  %v4674_v36 = vor.u32 %v5376_v16, %v4671_v21  ;;  %v4895_v0 = vld [vmem:[#allocation5 + $0xbb8] sm:$0xf0]  ;;  %v4770_v3 = vor.u32 %v5400_v61, %v4767_v62  ;;  %v5428_v35 = vld [vmem:[#allocation5 + $0xb8c] sm:$0xf] }
 0x16f   :  { %2994 = vmatpush.bf16.msra.mxu3 %v4354_v42  ;;  %v5372_v42 = vld [vmem:[#allocation5 + $0x9cc] sm:$0xf]  ;;  %v4623_v7 = vld [vmem:[#allocation5 + $0x998] sm:$0xf0] }
 0x170   :  { %v4658_v53 = vor.u32 %v5372_v42, %v4655_v46  ;;  %v4479_v11 = vld [vmem:[#allocation5 + $0x878] sm:$0xf0]  ;;  %v5360_v15 = vld [vmem:[#allocation5 + $0x96c] sm:$0xf] }
 0x171   :  { %2956 = vmatpush.bf16.msra.mxu0 %v3954_v55  ;;  %2969 = vmatpush.bf16.msra.mxu1 %v4082_v58  ;;  %v5336_v55 = vld [vmem:[#allocation5 + $0x8ac] sm:$0xf]  ;;  %v4607_v13 = vld [vmem:[#allocation5 + $0x978] sm:$0xf0] }
 0x172   :  { %2982 = vmatpush.bf16.msra.mxu2 %v4210_v59  ;;  %v5368_v58 = vld [vmem:[#allocation5 + $0x9ac] sm:$0xf]  ;;  %v4914_v59 = vor.u32 %v5436_v49, %v4911_v50  ;;  %v4514_v1 = vor.u32 %v5336_v55, %v4511_v56  ;;  %v4735_v16 = vld [vmem:[#allocation5 + $0xa78] sm:$0xf0]  ;;  %v4610_v24 = vor.u32 %v5360_v15, %v4607_v13  ;;  %v5449_v15 = vld [vmem:[#allocation8 + $0x30] sm:$0xff] }
 0x173   :  { %2995 = vmatpush.bf16.msra.mxu3 %v4338_v63  ;;  %v5432_v63 = vld [vmem:[#allocation5 + $0xbac] sm:$0xf]  ;;  %v4642_v2 = vor.u32 %v5368_v58, %v4639_v60  ;;  %v4847_v42 = vld [vmem:[#allocation5 + $0xb58] sm:$0xf0]  ;;  %v5465_v13 = vld [vmem:[#allocation8 + $0xb0] sm:$0xff] }
 0x174   :  { %v4898_v6 = vor.u32 %v5432_v63, %v4895_v0  ;;  %v5392_v14 = vld [vmem:[#allocation5 + $0xa6c] sm:$0xf]  ;;  %v4447_v50 = vld [vmem:[#allocation5 + $0x838] sm:$0xf0] }
 0x175   :  { %2957 = vmatpush.bf16.msra.mxu0 %v3938_v5  ;;  %2970 = vmatpush.bf16.msra.mxu1 %v4066_v43  ;;  %v4495_v5 = vld [vmem:[#allocation5 + $0x898] sm:$0xf0]  ;;  %v5396_v43 = vld [vmem:[#allocation5 + $0xa8c] sm:$0xf]  ;;  %v4738_v26 = vor.u32 %v5392_v14, %v4735_v16  ;;  %v5794_v16 = vld [vmem:[#allocation7] sm:$0xf] }
 0x176   :  { %2983 = vmatpush.bf16.msra.mxu2 %v4194_v8  ;;  %v4751_v8 = vld [vmem:[#allocation5 + $0xa98] sm:$0xf0]  ;;  %v5424_v17 = vld [vmem:[#allocation5 + $0xb6c] sm:$0xf] }
 0x177   :  { %2996 = vmatpush.bf16.msra.mxu3 %v4322_v9  ;;  %v4754_v10 = vor.u32 %v5396_v43, %v4751_v8  ;;  %v5328_v9 = vld [vmem:[#allocation5 + $0x86c] sm:$0xf]  ;;  %v4575_v55 = vld [vmem:[#allocation5 + $0x938] sm:$0xf0] }
 0x178   :  { %v4482_v21 = vor.u32 %v5328_v9, %v4479_v11  ;;  %v5356_v30 = vld [vmem:[#allocation5 + $0x94c] sm:$0xf]  ;;  %v4703_v58 = vld [vmem:[#allocation5 + $0xa38] sm:$0xf0] }
 0x179   :  { %2958 = vmatpush.bf16.msra.mxu0 %v3922_v19  ;;  %2971 = vmatpush.bf16.msra.mxu1 %v4050_v28  ;;  %v5782_v20 = vpop.f32.mrf.mxu0  ;;  %v5784_v12 = vpop.f32.mrf.mxu1  ;;  %v4863_v19 = vld [vmem:[#allocation5 + $0xb78] sm:$0xf0]  ;;  %v5324_v28 = vld [vmem:[#allocation5 + $0x84c] sm:$0xf] }
 0x17a   :  { %2984 = vmatpush.bf16.msra.mxu2 %v4178_v29  ;;  %v4463_v29 = vld [vmem:[#allocation5 + $0x858] sm:$0xf0]  ;;  %v5420_v45 = vld [vmem:[#allocation5 + $0xb4c] sm:$0xf] }
 0x17b   :  { %2997 = vmatpush.bf16.msra.mxu3 %v4306_v32  ;;  %v4866_v32 = vor.u32 %v5424_v17, %v4863_v19  ;;  %v5320_v49 = vld [vmem:[#allocation5 + $0x82c] sm:$0xf]  ;;  %v4831_v60 = vld [vmem:[#allocation5 + $0xb38] sm:$0xf0]  ;;  %v505_v17 = vperm.slane %v5794_v16, 2 }
 0x17c   :  { %2959 = vmatmul.bf16.vlgmr.msra.gmra.mxu0 %v5708_v37  ;;  %2972 = vmatmul.bf16.vlgmr.msra.gmra.mxu1 %v5712_v40  ;;  %v4879_v37 = vld [vmem:[#allocation5 + $0xb98] sm:$0xf0]  ;;  %v5384_v56 = vld [vmem:[#allocation5 + $0xa2c] sm:$0xf]  ;;  %v4450_v61 = vor.u32 %v5320_v49, %v4447_v50 }
 0x17d   :  { %3003 = vmatpush.bf16.msrb.mxu0 %v4546_v52  ;;  %3016 = vmatpush.bf16.msrb.mxu1 %v4674_v36  ;;  %v4882_v25 = vor.u32 %v5428_v35, %v4879_v37  ;;  %v4591_v52 = vld [vmem:[#allocation5 + $0x958] sm:$0xf0]  ;;  %v5388_v36 = vld [vmem:[#allocation5 + $0xa4c] sm:$0xf]  ;;  %v4706_v63 = vor.u32 %v5384_v56, %v4703_v58  ;;  %v3056_v56 = vmax.f32 %v5776_v57, 0.0  ;;  %v5459_v58 = vld [vmem:[#allocation8 + $0x80] sm:$0xff] }
 0x17e   :  { %3029 = vmatpush.bf16.msrb.mxu2 %v4802_v39  ;;  %2998 = vmatmul.bf16.vlgmr.msra.gmra.mxu3 %v5710_v38  ;;  %v4498_v38 = vor.u32 %v5332_v4, %v4495_v5  ;;  %v4719_v39 = vld [vmem:[#allocation5 + $0xa58] sm:$0xf0]  ;;  %v4594_v47 = vor.u32 %v5356_v30, %v4591_v52  ;;  %v5316_v0 = vld [vmem:[#allocation5 + $0x80c] sm:$0xf] }
 0x17f   :  { %3042 = vmatpush.bf16.msrb.mxu3 %v4930_v44  ;;  %2985 = vmatmul.bf16.vlgmr.msra.gmra.mxu2 %v5706_v34  ;;  %v5364_v34 = vld [vmem:[#allocation5 + $0x98c] sm:$0xf]  ;;  %v4466_v44 = vor.u32 %v5324_v28, %v4463_v29  ;;  %v4722_v48 = vor.u32 %v5388_v36, %v4719_v39  ;;  %v4559_v5 = vld [vmem:[#allocation5 + $0x918] sm:$0xf0]  ;;  %v5445_v39 = vld [vmem:[#allocation8 + $0x10] sm:$0xff] }
 0x180   :  { %v4626_v40 = vor.u32 %v5364_v34, %v4623_v7  ;;  %v5380_v34 = vld [vmem:[#allocation5 + $0xa0c] sm:$0xf]  ;;  %v4815_v8 = vld [vmem:[#allocation5 + $0xb18] sm:$0xf0] }
 0x181   :  { %3004 = vmatpush.bf16.msrb.mxu0 %v4530_v51  ;;  %3017 = vmatpush.bf16.msrb.mxu1 %v4658_v53  ;;  %v5788_v41 = vpop.f32.mrf.mxu3  ;;  %v2754_v46 = vpop.f32.mrf.mxu0  ;;  %v5352_v51 = vld [vmem:[#allocation5 + $0x92c] sm:$0xf]  ;;  %v5458_v9 = vld [vmem:[#allocation8 + $0x78] sm:$0xff] }
 0x182   :  { %3030 = vmatpush.bf16.msrb.mxu2 %v4786_v54  ;;  %v5786_v31 = vpop.f32.mrf.mxu2  ;;  %v2767_v53 = vpop.f32.mrf.mxu1  ;;  %v4850_v54 = vor.u32 %v5420_v45, %v4847_v42  ;;  %v4578_v62 = vor.u32 %v5352_v51, %v4575_v55  ;;  %v5412_v43 = vld [vmem:[#allocation5 + $0xb0c] sm:$0xf]  ;;  %v5466_v11 = vld [vmem:[#allocation8 + $0xb8] sm:$0xff]  ;;  %v5453_v42 = vld [vmem:[#allocation8 + $0x50] sm:$0xff] }
 0x183   :  { %3043 = vmatpush.bf16.msrb.mxu3 %v4914_v59  ;;  %v5416_v59 = vld [vmem:[#allocation5 + $0xb2c] sm:$0xf]  ;;  %v5446_v28 = vld [vmem:[#allocation8 + $0x18] sm:$0xff]  ;;  %v5461_v46 = vld [vmem:[#allocation8 + $0x90] sm:$0xff] }
 0x184   :  { %v4834_v4 = vor.u32 %v5416_v59, %v4831_v60  ;;  %v5448_v14 = vld [vmem:[#allocation8 + $0x28] sm:$0xff]  ;;  %v5454_v30 = vld [vmem:[#allocation8 + $0x58] sm:$0xff]  ;;  %v5443_v53 = vld [vmem:[#allocation8] sm:$0xff]  ;;  %v3060_v60 = vpack.c.bf16 %v3056_v56, %v3056_v56 }
 0x185   :  { %3005 = vmatpush.bf16.msrb.mxu0 %v4514_v1  ;;  %3018 = vmatpush.bf16.msrb.mxu1 %v4642_v2  ;;  %v4431_v1 = vld [vmem:[#allocation5 + $0x818] sm:$0xf0]  ;;  %v5348_v2 = vld [vmem:[#allocation5 + $0x90c] sm:$0xf]  ;;  %v5451_v55 = vld [vmem:[#allocation8 + $0x40] sm:$0xff] }
 0x186   :  { %3031 = vmatpush.bf16.msrb.mxu2 %v4770_v3  ;;  %v4434_v35 = vor.u32 %v5316_v0, %v4431_v1  ;;  %v4562_v37 = vor.u32 %v5348_v2, %v4559_v5  ;;  %v5456_v19 = vld [vmem:[#allocation8 + $0x68] sm:$0xff]  ;;  %v5462_v36 = vld [vmem:[#allocation8 + $0x98] sm:$0xff] }
 0x187   :  { %3044 = vmatpush.bf16.msrb.mxu3 %v4898_v6  ;;  %v4687_v6 = vld [vmem:[#allocation5 + $0xa18] sm:$0xf0]  ;;  %v5460_v51 = vld [vmem:[#allocation8 + $0x88] sm:$0xff] }
 0x189   :  { %3006 = vmatpush.bf16.msrb.mxu0 %v4498_v38  ;;  %3019 = vmatpush.bf16.msrb.mxu1 %v4626_v40  ;;  %v2793_v7 = vpop.f32.mrf.mxu3  ;;  %v4690_v38 = vor.u32 %v5380_v34, %v4687_v6  ;;  %v4818_v40 = vor.u32 %v5412_v43, %v4815_v8 }
 0x18a   :  { %3032 = vmatpush.bf16.msrb.mxu2 %v4754_v10  ;;  %v2780_v3 = vpop.f32.mrf.mxu2  ;;  %v5450_v10 = vld [vmem:[#allocation8 + $0x38] sm:$0xff] }
 0x18b   :  { %3045 = vmatpush.bf16.msrb.mxu3 %v4882_v25  ;;  %v5457_v25 = vld [vmem:[#allocation8 + $0x70] sm:$0xff] }
 0x18d   :  { %3007 = vmatpush.bf16.msrb.mxu0 %v4482_v21  ;;  %3020 = vmatpush.bf16.msrb.mxu1 %v4610_v24  ;;  %v5464_v21 = vld [vmem:[#allocation8 + $0xa8] sm:$0xff] }
 0x18e   :  { %3033 = vmatpush.bf16.msrb.mxu2 %v4738_v26  ;;  %v5463_v26 = vld [vmem:[#allocation8 + $0xa0] sm:$0xff] }
 0x18f   :  { %3046 = vmatpush.bf16.msrb.mxu3 %v4866_v32 }
 0x191   :  { %3008 = vmatpush.bf16.msrb.mxu0 %v4466_v44  ;;  %3021 = vmatpush.bf16.msrb.mxu1 %v4594_v47  ;;  %v5444_v47 = vld [vmem:[#allocation8 + $0x8] sm:$0xff] }
 0x192   :  { %3034 = vmatpush.bf16.msrb.mxu2 %v4722_v48  ;;  %v5452_v48 = vld [vmem:[#allocation8 + $0x48] sm:$0xff] }
 0x193   :  { %3047 = vmatpush.bf16.msrb.mxu3 %v4850_v54  ;;  %v3055_v54 = vmax.f32 %v5755_v33, 0.0 }
 0x195   :  { %3009 = vmatpush.bf16.msrb.mxu0 %v4450_v61  ;;  %3022 = vmatpush.bf16.msrb.mxu1 %v4578_v62  ;;  %v3059_v59 = vpack.c.bf16 %v3055_v54, %v3055_v54 }
 0x196   :  { %3035 = vmatpush.bf16.msrb.mxu2 %v4706_v63 }
 0x197   :  { %3048 = vmatpush.bf16.msrb.mxu3 %v4834_v4 }
 0x199   :  { %3010 = vmatpush.bf16.msrb.mxu0 %v4434_v35  ;;  %3023 = vmatpush.bf16.msrb.mxu1 %v4562_v37  ;;  %v2804_v24 = vpop.f32.mrf.mxu0 }
 0x19a   :  { %3036 = vmatpush.bf16.msrb.mxu2 %v4690_v38 }
 0x19b   :  { %3049 = vmatpush.bf16.msrb.mxu3 %v4818_v40 }
 0x19c   :  { %3011 = vmatmul.bf16.vlgmr.msrb.gmra.mxu0 %v5718_v18  ;;  %3024 = vmatmul.bf16.vlgmr.msrb.gmra.mxu1 %v5722_v23  ;;  %v5447_v18 = vld [vmem:[#allocation8 + $0x20] sm:$0xff]  ;;  %v2753_v23 = vadd.f32 %v5782_v20, %v505_v17 }
 0x19d   :  { %3323 = vmatpush.bf16.msra.mxu0 %v5450_v10  ;;  %3336 = vmatpush.bf16.msra.mxu1 %v5458_v9  ;;  %v5474_v10 = vld [vmem:[#allocation8 + $0xf8] sm:$0xff]  ;;  %v5471_v17 = vld [vmem:[#allocation8 + $0xe0] sm:$0xff] }
 0x19e   :  { %3037 = vmatmul.bf16.vlgmr.msrb.gmra.mxu2 %v5720_v22  ;;  %3050 = vmatmul.bf16.vlgmr.msrb.gmra.mxu3 %v5724_v27  ;;  %v5455_v22 = vld [vmem:[#allocation8 + $0x60] sm:$0xff]  ;;  %v2817_v27 = vpop.f32.mrf.mxu1  ;;  %v2766_v29 = vadd.f32 %v5784_v12, %v2753_v23 }
 0x19f   :  { %3349 = vmatpush.bf16.msra.mxu2 %v5466_v11  ;;  %3362 = vmatpush.bf16.msra.mxu3 %v5474_v10  ;;  %v5473_v11 = vld [vmem:[#allocation8 + $0xf0] sm:$0xff] }
 0x1a0   :  { %v2779_v20 = vadd.f32 %v5786_v31, %v2766_v29 }
 0x1a1   :  { %3324 = vmatpush.bf16.msra.mxu0 %v5449_v15  ;;  %3337 = vmatpush.bf16.msra.mxu1 %v5457_v25  ;;  %v2843_v52 = vpop.f32.mrf.mxu3  ;;  %v2806_v45 = vpop.f32.mrf.mxu0  ;;  %v5472_v25 = vld [vmem:[#allocation8 + $0xe8] sm:$0xff] }
 0x1a2   :  { %v2830_v32 = vpop.f32.mrf.mxu2  ;;  %v2792_v12 = vadd.f32 %v5788_v41, %v2779_v20 }
 0x1a3   :  { %3350 = vmatpush.bf16.msra.mxu2 %v5465_v13  ;;  %3363 = vmatpush.bf16.msra.mxu3 %v5473_v11 }
 0x1a4   :  { %v2805_v31 = vadd.f32 %v2804_v24, %v2792_v12 }
 0x1a5   :  { %3325 = vmatpush.bf16.msra.mxu0 %v5448_v14  ;;  %3338 = vmatpush.bf16.msra.mxu1 %v5456_v19  ;;  %v506_v19 = vperm.slane %v5794_v16, 3 }
 0x1a6   :  { %v2819_v44 = vpop.f32.mrf.mxu1  ;;  %v2818_v41 = vadd.f32 %v2817_v27, %v2805_v31 }
 0x1a7   :  { %3351 = vmatpush.bf16.msra.mxu2 %v5464_v21  ;;  %3364 = vmatpush.bf16.msra.mxu3 %v5472_v25  ;;  %v5470_v21 = vld [vmem:[#allocation8 + $0xd8] sm:$0xff] }
 0x1a8   :  { %v2831_v61 = vadd.f32 %v2830_v32, %v2818_v41 }
 0x1a9   :  { %3326 = vmatpush.bf16.msra.mxu0 %v5447_v18  ;;  %3339 = vmatpush.bf16.msra.mxu1 %v5455_v22  ;;  %v2845_v50 = vpop.f32.mrf.mxu3  ;;  %v5469_v18 = vld [vmem:[#allocation8 + $0xd0] sm:$0xff] }
 0x1aa   :  { %v2832_v49 = vpop.f32.mrf.mxu2  ;;  %v2844_v62 = vadd.f32 %v2843_v52, %v2831_v61  ;;  %v5467_v52 = vld [vmem:[#allocation8 + $0xc0] sm:$0xff] }
 0x1ab   :  { %3352 = vmatpush.bf16.msra.mxu2 %v5463_v26  ;;  %3365 = vmatpush.bf16.msra.mxu3 %v5471_v17  ;;  %v5468_v26 = vld [vmem:[#allocation8 + $0xc8] sm:$0xff] }
 0x1ad   :  { %3327 = vmatpush.bf16.msra.mxu0 %v5446_v28  ;;  %3340 = vmatpush.bf16.msra.mxu1 %v5454_v30 }
 0x1af   :  { %3353 = vmatpush.bf16.msra.mxu2 %v5462_v36  ;;  %3366 = vmatpush.bf16.msra.mxu3 %v5470_v21 }
 0x1b1   :  { %3328 = vmatpush.bf16.msra.mxu0 %v5445_v39  ;;  %3341 = vmatpush.bf16.msra.mxu1 %v5453_v42 }
 0x1b3   :  { %3354 = vmatpush.bf16.msra.mxu2 %v5461_v46  ;;  %3367 = vmatpush.bf16.msra.mxu3 %v5469_v18 }
 0x1b5   :  { %3329 = vmatpush.bf16.msra.mxu0 %v5444_v47  ;;  %3342 = vmatpush.bf16.msra.mxu1 %v5452_v48 }
 0x1b7   :  { %3355 = vmatpush.bf16.msra.mxu2 %v5460_v51  ;;  %3368 = vmatpush.bf16.msra.mxu3 %v5468_v26 }
 0x1b9   :  { %3330 = vmatpush.bf16.msra.mxu0 %v5443_v53  ;;  %3343 = vmatpush.bf16.msra.mxu1 %v5451_v55  ;;  %v2856_v63 = vpop.f32.mrf.mxu0  ;;  %v2869_v0 = vpop.f32.mrf.mxu1 }
 0x1ba   :  { %v2857_v33 = vadd.f32 %v2856_v63, %v2844_v62 }
 0x1bb   :  { %3356 = vmatpush.bf16.msra.mxu2 %v5459_v58  ;;  %3369 = vmatpush.bf16.msra.mxu3 %v5467_v52 }
 0x1bc   :  { %3331 = vmatmul.bf16.vlgmr.msra.gmra.mxu0 %v3059_v59  ;;  %3344 = vmatmul.bf16.vlgmr.msra.gmra.mxu1 %v3060_v60  ;;  %v2870_v1 = vadd.f32 %v2869_v0, %v2857_v33  ;;  %v5485_v60 = vld [vmem:[#allocation10] ss:$0 sm:$0xff] }
 0x1c1   :  { %v2895_v4 = vpop.f32.mrf.mxu3  ;;  %v2858_v57 = vpop.f32.mrf.mxu0 }
 0x1c2   :  { %v2882_v2 = vpop.f32.mrf.mxu2  ;;  %v2871_v5 = vpop.f32.mrf.mxu1 }
 0x1c3   :  { %v2883_v3 = vadd.f32 %v2882_v2, %v2870_v1 }
 0x1c5   :  { %v2896_v34 = vadd.f32 %v2895_v4, %v2883_v3 }
 0x1c7   :  { %v3057_v6 = vmax.f32 %v2896_v34, 0.0 }
 0x1c9   :  { %v3061_v7 = vpack.c.bf16 %v3057_v6, %v3057_v6  ;;  %v2897_v8 = vpop.f32.mrf.mxu3 }
 0x1ca   :  { %v2884_v43 = vpop.f32.mrf.mxu2 }
 0x1cb   :  { %3357 = vmatmul.bf16.vlgmr.msra.gmra.mxu2 %v3061_v7 }
 0x1d9   :  { %v2908_v35 = vpop.f32.mrf.mxu0  ;;  %v2921_v37 = vpop.f32.mrf.mxu1 }
 0x1da   :  { %v2909_v24 = vadd.f32 %v2908_v35, %v506_v19 }
 0x1dc   :  { %v2922_v27 = vadd.f32 %v2921_v37, %v2909_v24 }
 0x1e1   :  { %v2947_v40 = vpop.f32.mrf.mxu3  ;;  %v2910_v9 = vpop.f32.mrf.mxu0 }
 0x1e2   :  { %v2934_v38 = vpop.f32.mrf.mxu2  ;;  %v2923_v15 = vpop.f32.mrf.mxu1 }
 0x1e3   :  { %v2935_v30 = vadd.f32 %v2934_v38, %v2922_v27 }
 0x1e5   :  { %v2948_v39 = vadd.f32 %v2947_v40, %v2935_v30 }
 0x1e9   :  { %v2949_v14 = vpop.f32.mrf.mxu3 }
 0x1ea   :  { %v2936_v13 = vpop.f32.mrf.mxu2 }
 0x1f9   :  { %v2960_v23 = vpop.f32.mrf.mxu0  ;;  %v2973_v22 = vpop.f32.mrf.mxu1 }
 0x1fa   :  { %v2961_v20 = vadd.f32 %v2960_v23, %v2948_v39 }
 0x1fc   :  { %v2974_v42 = vadd.f32 %v2973_v22, %v2961_v20 }
 0x201   :  { %v2999_v29 = vpop.f32.mrf.mxu3  ;;  %v2962_v32 = vpop.f32.mrf.mxu0 }
 0x202   :  { %v2986_v28 = vpop.f32.mrf.mxu2  ;;  %v2975_v36 = vpop.f32.mrf.mxu1 }
 0x203   :  { %v2987_v44 = vadd.f32 %v2986_v28, %v2974_v42 }
 0x205   :  { %v3000_v46 = vadd.f32 %v2999_v29, %v2987_v44 }
 0x209   :  { %v3001_v16 = vpop.f32.mrf.mxu3 }
 0x20a   :  { %v2988_v45 = vpop.f32.mrf.mxu2 }
 0x219   :  { %v3012_v47 = vpop.f32.mrf.mxu0  ;;  %v3025_v12 = vpop.f32.mrf.mxu1 }
 0x21a   :  { %v3013_v48 = vadd.f32 %v3012_v47, %v3000_v46 }
 0x21c   :  { %v3026_v49 = vadd.f32 %v3025_v12, %v3013_v48 }
 0x221   :  { %v3038_v50 = vpop.f32.mrf.mxu2  ;;  %v3051_v53 = vpop.f32.mrf.mxu3 }
 0x222   :  { %v3039_v51 = vadd.f32 %v3038_v50, %v3026_v49  ;;  %v3014_v54 = vpop.f32.mrf.mxu0  ;;  %v3027_v31 = vpop.f32.mrf.mxu1 }
 0x224   :  { %v3052_v55 = vadd.f32 %v3051_v53, %v3039_v51 }
 0x226   :  { %v3058_v56 = vmax.f32 %v3052_v55, 0.0 }
 0x228   :  { %v3062_v58 = vpack.c.bf16 %v3058_v56, %v3058_v56 }
 0x229   :  { %v3040_v59 = vpop.f32.mrf.mxu2  ;;  %v3053_v41 = vpop.f32.mrf.mxu3 }
 0x22a   :  { %3370 = vmatmul.bf16.vlgmr.msra.gmra.mxu3 %v3062_v58 }
 0x239   :  { %v3332_v61 = vpop.f32.mrf.mxu0  ;;  %v3345_v63 = vpop.f32.mrf.mxu1 }
 0x23a   :  { %v3333_v62 = vadd.f32 %v5485_v60, %v3332_v61 }
 0x23c   :  { %v3346_v0 = vadd.f32 %v3345_v63, %v3333_v62 }
 0x241   :  { %v3334_v33 = vpop.f32.mrf.mxu0  ;;  %v3347_v1 = vpop.f32.mrf.mxu1 }
 0x24e   :  { %v3358_v2 = vpop.f32.mrf.mxu2 }
 0x24f   :  { %v3359_v3 = vadd.f32 %v3358_v2, %v3346_v0 }
 0x256   :  { %v3360_v4 = vpop.f32.mrf.mxu2 }
 0x2ad   :  { %v3371_v57 = vpop.f32.mrf.mxu3 }
 0x2ae   :  { %v3372_v5 = vadd.f32 %v3371_v57, %v3359_v3 }
 0x2b0   :  { %3375 = vst [vmem:[#allocation11] sm:$0xff] %v3372_v5 }
 0x2b1   :  { %3386 = dma.vmem_to_hbm [thread:$0]  %s3382_s4, 128, %s3384_s21, [#allocation4]  }
 0x2b5   :  { %v3373_v34 = vpop.f32.mrf.mxu3 }
 0x2b6   :  { %5637 = dma.done.wait [#allocation4], 128  }
 0x2b7   :  { %5638 = vsyncadd [#allocation4], 4294967168 }
 0x2b8   :  { %3391 = vsyncpa [#allocation3], 1 }
 0x2b9   :  { %3392 = vsyncpa [#allocation6], 1 }
 0x2ba   :  { %3393 = vsyncpa [#allocation9], 1 }
 0x2bb   :  { %3394 = vsyncpa [#allocation4], 1 }

</bundles_post_ra>
